<compile_context>
chip_gen: v5e
topology: v5e:2x2
jax: 0.10.0
libtpu: 0.0.40
codegen_flags: <defaults>
</compile_context>

<pallas_src>
import numpy as np
import jax
import jax.numpy as jnp
from jax import lax
from jax.experimental import pallas as pl
from jax.experimental.pallas import tpu as pltpu


def _round_up(x, m):
    return ((x + m - 1) // m) * m


# Row layout of the packed bias/readout-vector ref (each row is 128 lanes).
_ROW_B2 = 0                                  # message-MLP 2nd-layer bias
_ROW_BIR, _ROW_BIZ, _ROW_BIN = 1, 2, 3       # GRU input-side gate biases
_ROW_BHR, _ROW_BHZ, _ROW_BHN = 4, 5, 6       # GRU hidden-side gate biases
_ROW_BI1, _ROW_BJ1 = 7, 8                    # readout 1st-layer biases
_ROW_WI2, _ROW_WJ2 = 9, 10                   # readout 2nd-layer weight rows


# ----------------------------------------------------------------------------
# Fused kernel: embed -> one MPNN layer -> readout -> global_add_pool
# ----------------------------------------------------------------------------
def _mpnn_fused_kernel(
        x_ids, e_ids, src, dst, b_out,                 # SMEM scalar refs
        batch_v, node_tbl, edge_msg_tbl,               # VMEM
        w1h, w2, wi, wh, wi1, wj1, vec,                # VMEM (bf16 weights)
        out_ref,                                       # (1, G) f32 VMEM
        h0_s, hsrc_s, emsg_s, msg_s, m_s):             # VMEM scratch
    N = h0_s.shape[0]
    E = hsrc_s.shape[0]
    HP = h0_s.shape[1]
    G = out_ref.shape[1]
    f32 = jnp.float32
    bf16 = jnp.bfloat16

    # ---- 1) node embedding + input_proj (pre-folded): indexed row gather ---
    # NOTE: indices are assumed in-range (no bounds check), like the reference.
    @pl.loop(0, N)
    def _(i):
        h0_s[pl.ds(i, 1), :] = node_tbl[pl.ds(x_ids[i], 1), :]

    # ---- 2) per-edge gathers: source hidden state + pre-folded edge term ---
    @pl.loop(0, E)
    def _(e):
        hsrc_s[pl.ds(e, 1), :] = h0_s[pl.ds(src[e], 1), :]
        emsg_s[pl.ds(e, 1), :] = edge_msg_tbl[pl.ds(e_ids[e], 1), :]

    # ---- 3) message MLP (bf16 MXU operands, f32 accumulation) --------------
    # emsg_s already holds e_emb @ W1e + b1 (folded per edge type offline).
    z1 = jnp.dot(hsrc_s[...].astype(bf16), w1h[...],
                 preferred_element_type=f32) + emsg_s[...]
    a1 = jnp.maximum(z1, 0.0)
    msg_s[...] = (jnp.dot(a1.astype(bf16), w2[...], preferred_element_type=f32)
                  + vec[_ROW_B2:_ROW_B2 + 1, :])

    # ---- 4) scatter-add messages into destination nodes --------------------
    m_s[...] = jnp.zeros_like(m_s)

    @pl.loop(0, E)
    def _(e):
        d = dst[e]
        m_s[pl.ds(d, 1), :] = m_s[pl.ds(d, 1), :] + msg_s[pl.ds(e, 1), :]

    # ---- 5) GRUCell(input=m, hidden=h0): fused [HP,3HP] gate matmuls,
    #         gate slices at 128-lane boundaries (no relayout) ---------------
    h0 = h0_s[...]
    m = m_s[...]
    gi = jnp.dot(m.astype(bf16), wi[...], preferred_element_type=f32)
    gh = jnp.dot(h0.astype(bf16), wh[...], preferred_element_type=f32)
    r = jax.nn.sigmoid(gi[:, 0:HP] + vec[_ROW_BIR:_ROW_BIR + 1, :]
                       + gh[:, 0:HP] + vec[_ROW_BHR:_ROW_BHR + 1, :])
    z = jax.nn.sigmoid(gi[:, HP:2 * HP] + vec[_ROW_BIZ:_ROW_BIZ + 1, :]
                       + gh[:, HP:2 * HP] + vec[_ROW_BHZ:_ROW_BHZ + 1, :])
    n = jnp.tanh(gi[:, 2 * HP:3 * HP] + vec[_ROW_BIN:_ROW_BIN + 1, :]
                 + r * (gh[:, 2 * HP:3 * HP] + vec[_ROW_BHN:_ROW_BHN + 1, :]))
    hT = (1.0 - z) * n + z * h0                                     # [N, HP]

    # ---- 6) readout: two [HP,RP] matmuls + lane reductions (no block-diag,
    #         no lane concat); second layer is an XLU reduction --------------
    a_i = jnp.maximum(jnp.dot(hT.astype(bf16), wi1[...],
                              preferred_element_type=f32)
                      + vec[_ROW_BI1:_ROW_BI1 + 1, :], 0.0)
    a_j = jnp.maximum(jnp.dot(h0.astype(bf16), wj1[...],
                              preferred_element_type=f32)
                      + vec[_ROW_BJ1:_ROW_BJ1 + 1, :], 0.0)
    node_logit = (jnp.sum(a_i * vec[_ROW_WI2:_ROW_WI2 + 1, :],
                          axis=-1, keepdims=True)
                  + jnp.sum(a_j * vec[_ROW_WJ2:_ROW_WJ2 + 1, :],
                            axis=-1, keepdims=True)
                  + b_out[0])
    probs = jax.nn.sigmoid(node_logit)                              # [N, 1]

    # ---- 7) global_add_pool: masked VPU segment sum, lane-major output -----
    seg = (batch_v[...] == lax.broadcasted_iota(jnp.int32, (N, G), 1))
    out_ref[...] = jnp.sum(jnp.where(seg, probs, 0.0), axis=0).reshape(1, G)


# ----------------------------------------------------------------------------
# Parameters (same per-gate layout as PyTorch; fusion happens in prepare_params)
# ----------------------------------------------------------------------------
def init_params(key, node_vocab, edge_vocab, embed_dim, hidden_dim, read_hidden_dim):
    ks = jax.random.split(key, 40)
    k = iter(ks)

    def w(shape, scale=0.1):
        return (scale * jax.random.normal(next(k), shape)).astype(jnp.float32)

    p = {}
    p["node_emb"] = w((node_vocab, embed_dim))
    p["edge_emb"] = w((edge_vocab, embed_dim))
    p["proj_w"] = w((embed_dim, hidden_dim))
    p["proj_b"] = w((1, hidden_dim))
    # msg MLP: Linear(hidden+embed -> hidden), ReLU, Linear(hidden -> hidden)
    p["w1h"] = w((hidden_dim, hidden_dim))
    p["w1e"] = w((embed_dim, hidden_dim))
    p["b1"] = w((1, hidden_dim))
    p["w2"] = w((hidden_dim, hidden_dim))
    p["b2"] = w((1, hidden_dim))
    # GRUCell weights, stored [in, out], gates r/z/n, input-side and hidden-side
    for g in ("r", "z", "n"):
        p[f"wi{g}"] = w((hidden_dim, hidden_dim))
        p[f"wh{g}"] = w((hidden_dim, hidden_dim))
        p[f"bi{g}"] = w((1, hidden_dim))
        p[f"bh{g}"] = w((1, hidden_dim))
    # readout MLPs
    for r in ("i", "j"):
        p[f"w{r}1"] = w((hidden_dim, read_hidden_dim))
        p[f"b{r}1"] = w((1, read_hidden_dim))
        p[f"w{r}2"] = w((read_hidden_dim, 1))
        p[f"b{r}2"] = w((1, 1))
    return p


# ----------------------------------------------------------------------------
# One-time (load-time) weight fusion / 128-lane padding / bf16 cast.
# Hoisted out of the per-call forward path (perf review).  Folds are exact f32.
# ----------------------------------------------------------------------------
def prepare_params(p):
    H = p["proj_w"].shape[1]
    R = p["wi1"].shape[1]
    HP = _round_up(H, 128)
    RP = _round_up(R, 128)
    assert HP == RP, "bias packing assumes one 128-lane row per bias vector"
    bf16 = jnp.bfloat16
    f32 = jnp.float32

    def padc(a, cols):                               # pad lanes (axis 1)
        return jnp.pad(a, ((0, 0), (0, cols - a.shape[1])))

    def padrc(a, rows, cols):                        # pad sublanes + lanes
        return jnp.pad(a, ((0, rows - a.shape[0]), (0, cols - a.shape[1])))

    # input_proj folded into the node table:  h0 = node_tbl[id]
    node_tbl = p["node_emb"] @ p["proj_w"] + p["proj_b"]             # [Vn, H]
    node_tbl = padrc(node_tbl, _round_up(node_tbl.shape[0], 8), HP).astype(f32)
    # edge half of the message MLP folded per edge type:
    #   edge_msg_tbl[et] = edge_emb[et] @ W1e + b1
    edge_msg_tbl = p["edge_emb"] @ p["w1e"] + p["b1"]                # [Ve, H]
    edge_msg_tbl = padrc(edge_msg_tbl,
                         _round_up(edge_msg_tbl.shape[0], 8), HP).astype(f32)

    w1h = padrc(p["w1h"], HP, HP).astype(bf16)
    w2 = padrc(p["w2"], HP, HP).astype(bf16)
    wi = jnp.concatenate([padrc(p["wir"], HP, HP), padrc(p["wiz"], HP, HP),
                          padrc(p["win"], HP, HP)], axis=1).astype(bf16)
    wh = jnp.concatenate([padrc(p["whr"], HP, HP), padrc(p["whz"], HP, HP),
                          padrc(p["whn"], HP, HP)], axis=1).astype(bf16)
    wi1 = padrc(p["wi1"], HP, RP).astype(bf16)
    wj1 = padrc(p["wj1"], HP, RP).astype(bf16)

    # all small [1, H]/[1, R] vectors packed into ONE VMEM ref (one DMA)
    rows = [padc(p["b2"], HP),
            padc(p["bir"], HP), padc(p["biz"], HP), padc(p["bin"], HP),
            padc(p["bhr"], HP), padc(p["bhz"], HP), padc(p["bhn"], HP),
            padc(p["bi1"], RP), padc(p["bj1"], RP),
            padc(p["wi2"].reshape(1, R), RP), padc(p["wj2"].reshape(1, R), RP)]
    vec = jnp.concatenate(rows, axis=0).astype(f32)                  # [11, 128]
    vec = jnp.pad(vec, ((0, _round_up(vec.shape[0], 8) - vec.shape[0]), (0, 0)))

    b_out = (p["bi2"] + p["bj2"]).reshape(1).astype(f32)             # SMEM scalar

    return dict(node_tbl=node_tbl, edge_msg_tbl=edge_msg_tbl,
                w1h=w1h, w2=w2, wi=wi, wh=wh, wi1=wi1, wj1=wj1,
                vec=vec, b_out=b_out, HP=HP)


# ----------------------------------------------------------------------------
# Wrapper: single fused pallas_call (everything fits VMEM trivially at this
# size; see TODO at top for the production grid/tiling plan).
# ----------------------------------------------------------------------------
def mpnn_classifier_forward(prep, x_ids, edge_index, edge_attr, batch,
                            num_graphs, num_message_passes):
    # The PyTorch loop is degenerate (MPNNLayer re-embeds x each pass), so one
    # layer application reproduces it exactly for any num_message_passes >= 1.
    assert num_message_passes >= 1
    N = x_ids.shape[0]
    E = edge_attr.shape[0]
    HP = prep["HP"]

    x_ids = x_ids.reshape(-1).astype(jnp.int32)
    e_ids = edge_attr.reshape(-1).astype(jnp.int32)
    src = edge_index[0].reshape(-1).astype(jnp.int32)
    dst = edge_index[1].reshape(-1).astype(jnp.int32)
    batch_v = batch.reshape(N, 1).astype(jnp.int32)   # VMEM copy: VPU pool mask

    smem = pl.BlockSpec(memory_space=pltpu.MemorySpace.SMEM)
    vmem = pl.BlockSpec(memory_space=pltpu.MemorySpace.VMEM)

    args = (x_ids, e_ids, src, dst, prep["b_out"],
            batch_v, prep["node_tbl"], prep["edge_msg_tbl"],
            prep["w1h"], prep["w2"], prep["wi"], prep["wh"],
            prep["wi1"], prep["wj1"], prep["vec"])
    in_specs = [smem] * 5 + [vmem] * 10

    scores = pl.pallas_call(
        _mpnn_fused_kernel,
        out_shape=jax.ShapeDtypeStruct((1, num_graphs), jnp.float32),
        in_specs=in_specs,
        out_specs=vmem,
        scratch_shapes=[
            pltpu.VMEM((N, HP), jnp.float32),   # h0
            pltpu.VMEM((E, HP), jnp.float32),   # gathered h[src]
            pltpu.VMEM((E, HP), jnp.float32),   # gathered edge-MLP contribution
            pltpu.VMEM((E, HP), jnp.float32),   # messages
            pltpu.VMEM((N, HP), jnp.float32),   # aggregated messages
        ],
    )(*args)
    return scores.reshape(-1)


# ----------------------------------------------------------------------------
# Pure-JAX f32 reference (unfused, mirrors the PyTorch module; for correctness)
# ----------------------------------------------------------------------------
def reference_forward(p, x_ids, edge_index, edge_attr, batch,
                      num_graphs, num_message_passes):
    N = x_ids.shape[0]
    emb = p["node_emb"][x_ids]
    h0 = emb @ p["proj_w"] + p["proj_b"]
    e_emb = p["edge_emb"][edge_attr]
    src, dst = edge_index[0], edge_index[1]
    h = h0
    for _ in range(num_message_passes):
        hh = h0   # PyTorch MPNNLayer.forward re-embeds x -> starts from h0
        h_src = hh[src]
        a1 = jnp.maximum(h_src @ p["w1h"] + e_emb @ p["w1e"] + p["b1"], 0.0)
        msg = a1 @ p["w2"] + p["b2"]
        m = jax.ops.segment_sum(msg, dst, num_segments=N)
        r = jax.nn.sigmoid(m @ p["wir"] + p["bir"] + hh @ p["whr"] + p["bhr"])
        z = jax.nn.sigmoid(m @ p["wiz"] + p["biz"] + hh @ p["whz"] + p["bhz"])
        n = jnp.tanh(m @ p["win"] + p["bin"] + r * (hh @ p["whn"] + p["bhn"]))
        h = (1.0 - z) * n + z * hh
    i_score = (jnp.maximum(h @ p["wi1"] + p["bi1"], 0.0) @ p["wi2"] + p["bi2"]).reshape(-1)
    j_score = (jnp.maximum(h0 @ p["wj1"] + p["bj1"], 0.0) @ p["wj2"] + p["bj2"]).reshape(-1)
    probs = jax.nn.sigmoid(i_score + j_score)
    return jax.ops.segment_sum(probs, batch, num_segments=num_graphs)


if __name__ == "__main__":
    # small, deterministic problem
    NODE_VOCAB, EDGE_VOCAB = 8, 4
    EMBED_DIM, HIDDEN_DIM, READ_HIDDEN_DIM = 16, 32, 32
    NUM_PASSES = 3
    N_NODES, N_EDGES, N_GRAPHS = 16, 24, 2

    key = jax.random.PRNGKey(0)
    kp, kx, ks0, kd0, ks1, kd1, ke = jax.random.split(key, 7)

    params = init_params(kp, NODE_VOCAB, EDGE_VOCAB, EMBED_DIM, HIDDEN_DIM,
                         READ_HIDDEN_DIM)
    prep = prepare_params(params)   # one-time weight fusion (not per-call)

    x_ids = jax.random.randint(kx, (N_NODES,), 0, NODE_VOCAB, dtype=jnp.int32)
    # graph 0 = nodes [0,8), graph 1 = nodes [8,16); edges stay within a graph
    half = N_EDGES // 2
    src0 = jax.random.randint(ks0, (half,), 0, 8, dtype=jnp.int32)
    dst0 = jax.random.randint(kd0, (half,), 0, 8, dtype=jnp.int32)
    src1 = jax.random.randint(ks1, (half,), 8, 16, dtype=jnp.int32)
    dst1 = jax.random.randint(kd1, (half,), 8, 16, dtype=jnp.int32)
    edge_index = jnp.stack([jnp.concatenate([src0, src1]),
                            jnp.concatenate([dst0, dst1])], axis=0)
    edge_attr = jax.random.randint(ke, (N_EDGES,), 0, EDGE_VOCAB, dtype=jnp.int32)
    batch = jnp.concatenate([jnp.zeros((8,), jnp.int32),
                             jnp.ones((8,), jnp.int32)])

    out = mpnn_classifier_forward(prep, x_ids, edge_index, edge_attr, batch,
                                  N_GRAPHS, NUM_PASSES)
    out = jax.block_until_ready(out)

    ref = reference_forward(params, x_ids, edge_index, edge_attr, batch,
                            N_GRAPHS, NUM_PASSES)
    ref = jax.block_until_ready(ref)

    assert out.shape == (N_GRAPHS,)
    # bf16 MXU operands with f32 accumulation -> compare at 5e-3
    np.testing.assert_allclose(np.asarray(out), np.asarray(ref),
                               rtol=5e-3, atol=5e-3)
    print("KERNEL_OK")
</pallas_src>

<mosaic_0001>
module attributes {stable_mosaic.version = 11 : i64} {
  func.func @_mpnn_fused_kernel(%arg0: memref<16xi32, #tpu.memory_space<smem>>, %arg1: memref<24xi32, #tpu.memory_space<smem>>, %arg2: memref<24xi32, #tpu.memory_space<smem>>, %arg3: memref<24xi32, #tpu.memory_space<smem>>, %arg4: memref<1xf32, #tpu.memory_space<smem>>, %arg5: memref<16x1xi32, #tpu.memory_space<vmem>>, %arg6: memref<8x128xf32, #tpu.memory_space<vmem>>, %arg7: memref<8x128xf32, #tpu.memory_space<vmem>>, %arg8: memref<128x128xbf16, #tpu.memory_space<vmem>>, %arg9: memref<128x128xbf16, #tpu.memory_space<vmem>>, %arg10: memref<128x384xbf16, #tpu.memory_space<vmem>>, %arg11: memref<128x384xbf16, #tpu.memory_space<vmem>>, %arg12: memref<128x128xbf16, #tpu.memory_space<vmem>>, %arg13: memref<128x128xbf16, #tpu.memory_space<vmem>>, %arg14: memref<16x128xf32, #tpu.memory_space<vmem>>, %arg15: memref<1x2xf32, #tpu.memory_space<vmem>>, %arg16: memref<16x128xf32, #tpu.memory_space<vmem>>, %arg17: memref<24x128xf32, #tpu.memory_space<vmem>>, %arg18: memref<24x128xf32, #tpu.memory_space<vmem>>, %arg19: memref<24x128xf32, #tpu.memory_space<vmem>>, %arg20: memref<16x128xf32, #tpu.memory_space<vmem>>) attributes {dimension_semantics = [], scalar_prefetch = 0 : i64, scratch_operands = 5 : i64, tpu.core_type = #tpu.core_type<tc>} {
    %c0_i32 = arith.constant 0 : i32
    %c16_i32 = arith.constant 16 : i32
    %0 = arith.addi %c0_i32, %c16_i32 : i32
    %c1_i32 = arith.constant 1 : i32
    scf.for %arg21 = %c0_i32 to %0 step %c1_i32  : i32 {
      %c1_i32_65 = arith.constant 1 : i32
      %118 = arith.muli %arg21, %c1_i32_65 : i32
      %c0_i32_66 = arith.constant 0 : i32
      %119 = arith.addi %c0_i32_66, %118 : i32
      %120 = arith.index_cast %119 : i32 to index
      %121 = memref.load %arg0[%120] : memref<16xi32, #tpu.memory_space<smem>>
      %122 = arith.index_cast %121 : i32 to index
      %c0_67 = arith.constant 0 : index
      %123 = vector.load %arg6[%122, %c0_67] : memref<8x128xf32, #tpu.memory_space<vmem>>, vector<1x128xf32>
      %124 = arith.index_cast %119 : i32 to index
      %c0_68 = arith.constant 0 : index
      %125 = vector.load %arg16[%124, %c0_68] : memref<16x128xf32, #tpu.memory_space<vmem>>, vector<1x128xf32>
      tpu.vector_store %arg16[%124, %c0_68], %123 {strides = array<i32>} : memref<16x128xf32, #tpu.memory_space<vmem>>, vector<1x128xf32>,
    }
    %c16_i32_0 = arith.constant 16 : i32
    %c0_i32_1 = arith.constant 0 : i32
    %c24_i32 = arith.constant 24 : i32
    %1 = arith.addi %c0_i32_1, %c24_i32 : i32
    %c1_i32_2 = arith.constant 1 : i32
    scf.for %arg21 = %c0_i32_1 to %1 step %c1_i32_2  : i32 {
      %c1_i32_65 = arith.constant 1 : i32
      %118 = arith.muli %arg21, %c1_i32_65 : i32
      %c0_i32_66 = arith.constant 0 : i32
      %119 = arith.addi %c0_i32_66, %118 : i32
      %120 = arith.index_cast %119 : i32 to index
      %121 = memref.load %arg2[%120] : memref<24xi32, #tpu.memory_space<smem>>
      %122 = arith.index_cast %121 : i32 to index
      %c0_67 = arith.constant 0 : index
      %123 = vector.load %arg16[%122, %c0_67] : memref<16x128xf32, #tpu.memory_space<vmem>>, vector<1x128xf32>
      %124 = arith.index_cast %119 : i32 to index
      %c0_68 = arith.constant 0 : index
      %125 = vector.load %arg17[%124, %c0_68] : memref<24x128xf32, #tpu.memory_space<vmem>>, vector<1x128xf32>
      tpu.vector_store %arg17[%124, %c0_68], %123 {strides = array<i32>} : memref<24x128xf32, #tpu.memory_space<vmem>>, vector<1x128xf32>,
      %126 = arith.index_cast %119 : i32 to index
      %127 = memref.load %arg1[%126] : memref<24xi32, #tpu.memory_space<smem>>
      %128 = arith.index_cast %127 : i32 to index
      %c0_69 = arith.constant 0 : index
      %129 = vector.load %arg7[%128, %c0_69] : memref<8x128xf32, #tpu.memory_space<vmem>>, vector<1x128xf32>
      %130 = arith.index_cast %119 : i32 to index
      %c0_70 = arith.constant 0 : index
      %131 = vector.load %arg18[%130, %c0_70] : memref<24x128xf32, #tpu.memory_space<vmem>>, vector<1x128xf32>
      tpu.vector_store %arg18[%130, %c0_70], %129 {strides = array<i32>} : memref<24x128xf32, #tpu.memory_space<vmem>>, vector<1x128xf32>,
    }
    %c24_i32_3 = arith.constant 24 : i32
    %c0 = arith.constant 0 : index
    %c0_4 = arith.constant 0 : index
    %2 = vector.load %arg17[%c0, %c0_4] : memref<24x128xf32, #tpu.memory_space<vmem>>, vector<24x128xf32>
    %3 = arith.truncf %2 : vector<24x128xf32> to vector<24x128xbf16>
    %c0_5 = arith.constant 0 : index
    %c0_6 = arith.constant 0 : index
    %4 = vector.load %arg8[%c0_5, %c0_6] : memref<128x128xbf16, #tpu.memory_space<vmem>>, vector<128x128xbf16>
    %cst = arith.constant dense<0.000000e+00> : vector<24x128xf32>
    %5 = tpu.matmul %3, %4, %cst {dimension_numbers = #tpu.dot_dimension_numbers<[1], [0], [0], [1], [0, 0, 1, 1], [], []>} : vector<24x128xbf16>, vector<128x128xbf16>, vector<24x128xf32> -> vector<24x128xf32>
    %c0_7 = arith.constant 0 : index
    %c0_8 = arith.constant 0 : index
    %6 = vector.load %arg18[%c0_7, %c0_8] : memref<24x128xf32, #tpu.memory_space<vmem>>, vector<24x128xf32>
    %7 = arith.addf %5, %6 : vector<24x128xf32>
    %cst_9 = arith.constant 0.000000e+00 : f32
    %8 = vector.broadcast %cst_9 : f32 to vector<24x128xf32>
    %9 = arith.maximumf %7, %8 : vector<24x128xf32>
    %10 = arith.truncf %9 : vector<24x128xf32> to vector<24x128xbf16>
    %c0_10 = arith.constant 0 : index
    %c0_11 = arith.constant 0 : index
    %11 = vector.load %arg9[%c0_10, %c0_11] : memref<128x128xbf16, #tpu.memory_space<vmem>>, vector<128x128xbf16>
    %cst_12 = arith.constant dense<0.000000e+00> : vector<24x128xf32>
    %12 = tpu.matmul %10, %11, %cst_12 {dimension_numbers = #tpu.dot_dimension_numbers<[1], [0], [0], [1], [0, 0, 1, 1], [], []>} : vector<24x128xbf16>, vector<128x128xbf16>, vector<24x128xf32> -> vector<24x128xf32>
    %c0_13 = arith.constant 0 : index
    %c0_14 = arith.constant 0 : index
    %13 = vector.load %arg14[%c0_13, %c0_14] : memref<16x128xf32, #tpu.memory_space<vmem>>, vector<1x128xf32>
    %14 = vector.broadcast %13 : vector<1x128xf32> to vector<24x128xf32>
    %15 = arith.addf %12, %14 : vector<24x128xf32>
    %c0_15 = arith.constant 0 : index
    %c0_16 = arith.constant 0 : index
    %16 = vector.load %arg19[%c0_15, %c0_16] : memref<24x128xf32, #tpu.memory_space<vmem>>, vector<24x128xf32>
    tpu.vector_store %arg19[%c0_15, %c0_16], %15 {strides = array<i32>} : memref<24x128xf32, #tpu.memory_space<vmem>>, vector<24x128xf32>,
    %cst_17 = arith.constant 0.000000e+00 : f32
    %17 = vector.broadcast %cst_17 : f32 to vector<16x128xf32>
    %c0_18 = arith.constant 0 : index
    %c0_19 = arith.constant 0 : index
    %18 = vector.load %arg20[%c0_18, %c0_19] : memref<16x128xf32, #tpu.memory_space<vmem>>, vector<16x128xf32>
    tpu.vector_store %arg20[%c0_18, %c0_19], %17 {strides = array<i32>} : memref<16x128xf32, #tpu.memory_space<vmem>>, vector<16x128xf32>,
    %c0_i32_20 = arith.constant 0 : i32
    %c24_i32_21 = arith.constant 24 : i32
    %19 = arith.addi %c0_i32_20, %c24_i32_21 : i32
    %c1_i32_22 = arith.constant 1 : i32
    scf.for %arg21 = %c0_i32_20 to %19 step %c1_i32_22  : i32 {
      %c1_i32_65 = arith.constant 1 : i32
      %118 = arith.muli %arg21, %c1_i32_65 : i32
      %c0_i32_66 = arith.constant 0 : i32
      %119 = arith.addi %c0_i32_66, %118 : i32
      %120 = arith.index_cast %119 : i32 to index
      %121 = memref.load %arg3[%120] : memref<24xi32, #tpu.memory_space<smem>>
      %122 = arith.index_cast %121 : i32 to index
      %c0_67 = arith.constant 0 : index
      %123 = vector.load %arg20[%122, %c0_67] : memref<16x128xf32, #tpu.memory_space<vmem>>, vector<1x128xf32>
      %124 = arith.index_cast %119 : i32 to index
      %c0_68 = arith.constant 0 : index
      %125 = vector.load %arg19[%124, %c0_68] : memref<24x128xf32, #tpu.memory_space<vmem>>, vector<1x128xf32>
      %126 = arith.addf %123, %125 : vector<1x128xf32>
      %127 = arith.index_cast %121 : i32 to index
      %c0_69 = arith.constant 0 : index
      %128 = vector.load %arg20[%127, %c0_69] : memref<16x128xf32, #tpu.memory_space<vmem>>, vector<1x128xf32>
      tpu.vector_store %arg20[%127, %c0_69], %126 {strides = array<i32>} : memref<16x128xf32, #tpu.memory_space<vmem>>, vector<1x128xf32>,
    }
    %c24_i32_23 = arith.constant 24 : i32
    %c0_24 = arith.constant 0 : index
    %c0_25 = arith.constant 0 : index
    %20 = vector.load %arg16[%c0_24, %c0_25] : memref<16x128xf32, #tpu.memory_space<vmem>>, vector<16x128xf32>
    %c0_26 = arith.constant 0 : index
    %c0_27 = arith.constant 0 : index
    %21 = vector.load %arg20[%c0_26, %c0_27] : memref<16x128xf32, #tpu.memory_space<vmem>>, vector<16x128xf32>
    %22 = arith.truncf %21 : vector<16x128xf32> to vector<16x128xbf16>
    %c0_28 = arith.constant 0 : index
    %c0_29 = arith.constant 0 : index
    %23 = vector.load %arg10[%c0_28, %c0_29] : memref<128x384xbf16, #tpu.memory_space<vmem>>, vector<128x384xbf16>
    %cst_30 = arith.constant dense<0.000000e+00> : vector<16x384xf32>
    %24 = tpu.matmul %22, %23, %cst_30 {dimension_numbers = #tpu.dot_dimension_numbers<[1], [0], [0], [1], [0, 0, 1, 1], [], []>} : vector<16x128xbf16>, vector<128x384xbf16>, vector<16x384xf32> -> vector<16x384xf32>
    %25 = arith.truncf %20 : vector<16x128xf32> to vector<16x128xbf16>
    %c0_31 = arith.constant 0 : index
    %c0_32 = arith.constant 0 : index
    %26 = vector.load %arg11[%c0_31, %c0_32] : memref<128x384xbf16, #tpu.memory_space<vmem>>, vector<128x384xbf16>
    %cst_33 = arith.constant dense<0.000000e+00> : vector<16x384xf32>
    %27 = tpu.matmul %25, %26, %cst_33 {dimension_numbers = #tpu.dot_dimension_numbers<[1], [0], [0], [1], [0, 0, 1, 1], [], []>} : vector<16x128xbf16>, vector<128x384xbf16>, vector<16x384xf32> -> vector<16x384xf32>
    %28 = vector.extract_strided_slice %24 {offsets = [0, 0], sizes = [16, 128], strides = [1, 1]} : vector<16x384xf32> to vector<16x128xf32>
    %c1 = arith.constant 1 : index
    %c0_34 = arith.constant 0 : index
    %29 = vector.load %arg14[%c1, %c0_34] : memref<16x128xf32, #tpu.memory_space<vmem>>, vector<1x128xf32>
    %30 = vector.broadcast %29 : vector<1x128xf32> to vector<16x128xf32>
    %31 = arith.addf %28, %30 : vector<16x128xf32>
    %32 = vector.extract_strided_slice %27 {offsets = [0, 0], sizes = [16, 128], strides = [1, 1]} : vector<16x384xf32> to vector<16x128xf32>
    %33 = arith.addf %31, %32 : vector<16x128xf32>
    %c4 = arith.constant 4 : index
    %c0_35 = arith.constant 0 : index
    %34 = vector.load %arg14[%c4, %c0_35] : memref<16x128xf32, #tpu.memory_space<vmem>>, vector<1x128xf32>
    %35 = vector.broadcast %34 : vector<1x128xf32> to vector<16x128xf32>
    %36 = arith.addf %33, %35 : vector<16x128xf32>
    %37 = arith.negf %36 : vector<16x128xf32>
    %38 = math.exp %37 : vector<16x128xf32>
    %cst_36 = arith.constant 1.000000e+00 : f32
    %39 = vector.broadcast %cst_36 : f32 to vector<16x128xf32>
    %40 = arith.addf %39, %38 : vector<16x128xf32>
    %41 = arith.divf %39, %40 : vector<16x128xf32>
    %42 = vector.extract_strided_slice %24 {offsets = [0, 128], sizes = [16, 128], strides = [1, 1]} : vector<16x384xf32> to vector<16x128xf32>
    %c2 = arith.constant 2 : index
    %c0_37 = arith.constant 0 : index
    %43 = vector.load %arg14[%c2, %c0_37] : memref<16x128xf32, #tpu.memory_space<vmem>>, vector<1x128xf32>
    %44 = vector.broadcast %43 : vector<1x128xf32> to vector<16x128xf32>
    %45 = arith.addf %42, %44 : vector<16x128xf32>
    %46 = vector.extract_strided_slice %27 {offsets = [0, 128], sizes = [16, 128], strides = [1, 1]} : vector<16x384xf32> to vector<16x128xf32>
    %47 = arith.addf %45, %46 : vector<16x128xf32>
    %c5 = arith.constant 5 : index
    %c0_38 = arith.constant 0 : index
    %48 = vector.load %arg14[%c5, %c0_38] : memref<16x128xf32, #tpu.memory_space<vmem>>, vector<1x128xf32>
    %49 = vector.broadcast %48 : vector<1x128xf32> to vector<16x128xf32>
    %50 = arith.addf %47, %49 : vector<16x128xf32>
    %51 = arith.negf %50 : vector<16x128xf32>
    %52 = math.exp %51 : vector<16x128xf32>
    %cst_39 = arith.constant 1.000000e+00 : f32
    %53 = vector.broadcast %cst_39 : f32 to vector<16x128xf32>
    %54 = arith.addf %53, %52 : vector<16x128xf32>
    %55 = arith.divf %53, %54 : vector<16x128xf32>
    %56 = vector.extract_strided_slice %24 {offsets = [0, 256], sizes = [16, 128], strides = [1, 1]} : vector<16x384xf32> to vector<16x128xf32>
    %c3 = arith.constant 3 : index
    %c0_40 = arith.constant 0 : index
    %57 = vector.load %arg14[%c3, %c0_40] : memref<16x128xf32, #tpu.memory_space<vmem>>, vector<1x128xf32>
    %58 = vector.broadcast %57 : vector<1x128xf32> to vector<16x128xf32>
    %59 = arith.addf %56, %58 : vector<16x128xf32>
    %60 = vector.extract_strided_slice %27 {offsets = [0, 256], sizes = [16, 128], strides = [1, 1]} : vector<16x384xf32> to vector<16x128xf32>
    %c6 = arith.constant 6 : index
    %c0_41 = arith.constant 0 : index
    %61 = vector.load %arg14[%c6, %c0_41] : memref<16x128xf32, #tpu.memory_space<vmem>>, vector<1x128xf32>
    %62 = vector.broadcast %61 : vector<1x128xf32> to vector<16x128xf32>
    %63 = arith.addf %60, %62 : vector<16x128xf32>
    %64 = arith.mulf %41, %63 : vector<16x128xf32>
    %65 = arith.addf %59, %64 : vector<16x128xf32>
    %66 = math.tanh %65 : vector<16x128xf32>
    %cst_42 = arith.constant 1.000000e+00 : f32
    %67 = vector.broadcast %cst_42 : f32 to vector<16x128xf32>
    %68 = arith.subf %67, %55 : vector<16x128xf32>
    %69 = arith.mulf %68, %66 : vector<16x128xf32>
    %70 = arith.mulf %55, %20 : vector<16x128xf32>
    %71 = arith.addf %69, %70 : vector<16x128xf32>
    %72 = arith.truncf %71 : vector<16x128xf32> to vector<16x128xbf16>
    %c0_43 = arith.constant 0 : index
    %c0_44 = arith.constant 0 : index
    %73 = vector.load %arg12[%c0_43, %c0_44] : memref<128x128xbf16, #tpu.memory_space<vmem>>, vector<128x128xbf16>
    %cst_45 = arith.constant dense<0.000000e+00> : vector<16x128xf32>
    %74 = tpu.matmul %72, %73, %cst_45 {dimension_numbers = #tpu.dot_dimension_numbers<[1], [0], [0], [1], [0, 0, 1, 1], [], []>} : vector<16x128xbf16>, vector<128x128xbf16>, vector<16x128xf32> -> vector<16x128xf32>
    %c7 = arith.constant 7 : index
    %c0_46 = arith.constant 0 : index
    %75 = vector.load %arg14[%c7, %c0_46] : memref<16x128xf32, #tpu.memory_space<vmem>>, vector<1x128xf32>
    %76 = vector.broadcast %75 : vector<1x128xf32> to vector<16x128xf32>
    %77 = arith.addf %74, %76 : vector<16x128xf32>
    %cst_47 = arith.constant 0.000000e+00 : f32
    %78 = vector.broadcast %cst_47 : f32 to vector<16x128xf32>
    %79 = arith.maximumf %77, %78 : vector<16x128xf32>
    %80 = arith.truncf %20 : vector<16x128xf32> to vector<16x128xbf16>
    %c0_48 = arith.constant 0 : index
    %c0_49 = arith.constant 0 : index
    %81 = vector.load %arg13[%c0_48, %c0_49] : memref<128x128xbf16, #tpu.memory_space<vmem>>, vector<128x128xbf16>
    %cst_50 = arith.constant dense<0.000000e+00> : vector<16x128xf32>
    %82 = tpu.matmul %80, %81, %cst_50 {dimension_numbers = #tpu.dot_dimension_numbers<[1], [0], [0], [1], [0, 0, 1, 1], [], []>} : vector<16x128xbf16>, vector<128x128xbf16>, vector<16x128xf32> -> vector<16x128xf32>
    %c8 = arith.constant 8 : index
    %c0_51 = arith.constant 0 : index
    %83 = vector.load %arg14[%c8, %c0_51] : memref<16x128xf32, #tpu.memory_space<vmem>>, vector<1x128xf32>
    %84 = vector.broadcast %83 : vector<1x128xf32> to vector<16x128xf32>
    %85 = arith.addf %82, %84 : vector<16x128xf32>
    %cst_52 = arith.constant 0.000000e+00 : f32
    %86 = vector.broadcast %cst_52 : f32 to vector<16x128xf32>
    %87 = arith.maximumf %85, %86 : vector<16x128xf32>
    %c9 = arith.constant 9 : index
    %c0_53 = arith.constant 0 : index
    %88 = vector.load %arg14[%c9, %c0_53] : memref<16x128xf32, #tpu.memory_space<vmem>>, vector<1x128xf32>
    %89 = vector.broadcast %88 : vector<1x128xf32> to vector<16x128xf32>
    %90 = arith.mulf %79, %89 : vector<16x128xf32>
    %cst_54 = arith.constant dense<0.000000e+00> : vector<16xf32>
    %91 = vector.multi_reduction <add>, %90, %cst_54 [1] : vector<16x128xf32> to vector<16xf32>
    %92 = vector.shape_cast %91 : vector<16xf32> to vector<16x1xf32>
    %c10 = arith.constant 10 : index
    %c0_55 = arith.constant 0 : index
    %93 = vector.load %arg14[%c10, %c0_55] : memref<16x128xf32, #tpu.memory_space<vmem>>, vector<1x128xf32>
    %94 = vector.broadcast %93 : vector<1x128xf32> to vector<16x128xf32>
    %95 = arith.mulf %87, %94 : vector<16x128xf32>
    %cst_56 = arith.constant dense<0.000000e+00> : vector<16xf32>
    %96 = vector.multi_reduction <add>, %95, %cst_56 [1] : vector<16x128xf32> to vector<16xf32>
    %97 = vector.shape_cast %96 : vector<16xf32> to vector<16x1xf32>
    %98 = arith.addf %92, %97 : vector<16x1xf32>
    %c0_57 = arith.constant 0 : index
    %99 = memref.load %arg4[%c0_57] : memref<1xf32, #tpu.memory_space<smem>>
    %100 = vector.broadcast %99 : f32 to vector<16x1xf32>
    %101 = arith.addf %98, %100 : vector<16x1xf32>
    %102 = arith.negf %101 : vector<16x1xf32>
    %103 = math.exp %102 : vector<16x1xf32>
    %cst_58 = arith.constant 1.000000e+00 : f32
    %104 = vector.broadcast %cst_58 : f32 to vector<16x1xf32>
    %105 = arith.addf %104, %103 : vector<16x1xf32>
    %106 = arith.divf %104, %105 : vector<16x1xf32>
    %c0_59 = arith.constant 0 : index
    %c0_60 = arith.constant 0 : index
    %107 = vector.load %arg5[%c0_59, %c0_60] : memref<16x1xi32, #tpu.memory_space<vmem>>, vector<16x1xi32>
    %108 = tpu.iota {dimensions = array<i32: 1>} : vector<16x2xi32>
    %109 = vector.broadcast %107 : vector<16x1xi32> to vector<16x2xi32>
    %110 = arith.cmpi eq, %109, %108 : vector<16x2xi32>
    %cst_61 = arith.constant 0.000000e+00 : f32
    %111 = vector.shape_cast %106 : vector<16x1xf32> to vector<16x1xf32>
    %112 = vector.broadcast %111 : vector<16x1xf32> to vector<16x2xf32>
    %113 = vector.broadcast %cst_61 : f32 to vector<16x2xf32>
    %114 = arith.select %110, %112, %113 : vector<16x2xi1>, vector<16x2xf32>
    %cst_62 = arith.constant dense<0.000000e+00> : vector<2xf32>
    %115 = vector.multi_reduction <add>, %114, %cst_62 [0] : vector<16x2xf32> to vector<2xf32>
    %116 = vector.shape_cast %115 : vector<2xf32> to vector<1x2xf32>
    %c0_63 = arith.constant 0 : index
    %c0_64 = arith.constant 0 : index
    %117 = vector.load %arg15[%c0_63, %c0_64] : memref<1x2xf32, #tpu.memory_space<vmem>>, vector<1x2xf32>
    tpu.vector_store %arg15[%c0_63, %c0_64], %116 {strides = array<i32>} : memref<1x2xf32, #tpu.memory_space<vmem>>, vector<1x2xf32>,
    return
  }
}

</mosaic_0001>

<bundles_post_ra>
// kernel: tpu_custom_call.1
= control target key start
LH: loop header
LB: loop body
LE: loop exit
PB: predicated region body
PF: predicated region fallthrough
CT: control target
= control target key end

     0   :  { %s2304_s0 = inlined_call_operand.vmem [shape: s32[16], index: 0, kind: input, shape index: {}]   ;;  %s2305_s1 = inlined_call_operand.vmem [shape: s32[24], index: 1, kind: input, shape index: {}]   ;;  %s2306_s2 = inlined_call_operand.vmem [shape: s32[24], index: 2, kind: input, shape index: {}]   ;;  %s2307_s3 = inlined_call_operand.vmem [shape: s32[24], index: 3, kind: input, shape index: {}]   ;;  %s2308_s4 = inlined_call_operand.<no memory space> [shape: f32[1], index: 4, kind: input, shape index: {}]   ;;  %s2309_s5 = inlined_call_operand.vmem [shape: s32[16,1], index: 5, kind: input, shape index: {}]   ;;  %s2310_s6 = inlined_call_operand.hbm [shape: f32[8,128], index: 6, kind: input, shape index: {}]   ;;  %s2311_s7 = inlined_call_operand.hbm [shape: f32[8,128], index: 7, kind: input, shape index: {}]   ;;  %s2312_s8 = inlined_call_operand.hbm [shape: bf16[128,128], index: 8, kind: input, shape index: {}]   ;;  %s2313_s9 = inlined_call_operand.hbm [shape: bf16[128,128], index: 9, kind: input, shape index: {}]   ;;  %s2314_s10 = inlined_call_operand.hbm [shape: bf16[128,384], index: 10, kind: input, shape index: {}]   ;;  %s2315_s11 = inlined_call_operand.hbm [shape: bf16[128,384], index: 11, kind: input, shape index: {}]   ;;  %s2316_s12 = inlined_call_operand.hbm [shape: bf16[128,128], index: 12, kind: input, shape index: {}]   ;;  %s2317_s13 = inlined_call_operand.hbm [shape: bf16[128,128], index: 13, kind: input, shape index: {}]   ;;  %s2318_s14 = inlined_call_operand.vmem [shape: f32[16,128], index: 14, kind: input, shape index: {}]   ;;  %s2319_s15 = inlined_call_operand.hbm [shape: f32[1,2], index: 15, kind: output, shape index: {}]  }
   0x1   :  { %20 = sst [smem:[#allocation7]] %s2308_s4 }
   0x2   :  { %21 = vsyncpa [#allocation11], 0 }
   0x3   :  { %22 = vsyncpa [#allocation13], 0 }
   0x4   :  { %23 = vsyncpa [#allocation16], 0 }
   0x5   :  { %24 = vsyncpa [#allocation9], 0 }
   0x6   :  { %25 = vsyncpa [#allocation19], 0 }
   0x7   :  { %26 = vsyncpa [#allocation22], 0 }
   0x8   :  { %27 = vsyncpa [#allocation25], 0 }
   0x9   :  { %28 = vsyncpa [#allocation28], 0  ;;  %s44_s22 = sshll.u32 %s2305_s1, 4  ;;  %s45_s22 = int_to_ptr.vmem [resolvable:$true] %s44_s22 }
   0xa   :  { %29 = vsyncpa [#allocation10], 0  ;;  %s86_s25 = sshll.u32 %s2311_s7, 4  ;;  %s2067_s26 = smov [#allocation12]   ;;  %s87_s25 = int_to_ptr.hbm [resolvable:$true] %s86_s25 }
   0xb   :  { %47 = dma.vmem_to_smem %s45_s22, 16, %s2067_s26, [#allocation13]  }
   0xc   :  { %s2068_s4 = smov [#allocation18]   ;;  %s109_s30 = sshll.u32 %s2313_s9, 4  ;;  %s110_s30 = int_to_ptr.hbm [resolvable:$true] %s109_s30 }
   0xd   :  { %s88_s27 = sshll.u32 %s2068_s4, 4  ;;  %s2069_s16 = smov [#allocation21]   ;;  %s89_s27 = int_to_ptr.vmem [resolvable:$true] %s88_s27 }
   0xe   :  { %91 = dma.hbm_to_vmem [thread:$0]  %s87_s25, 128, %s89_s27, [#allocation19]  }
   0xf   :  { %s111_s1 = sshll.u32 %s2069_s16, 4  ;;  %s2070_s17 = smov 64   ;;  %s112_s1 = int_to_ptr.vmem [resolvable:$true] %s111_s1 }
  0x10   :  { %s2071_s18 = smov 4   ;;  %s135_s20 = sshll.u32 %s2315_s11, 4  ;;  %s136_s20 = int_to_ptr.hbm [resolvable:$true] %s135_s20 }
  0x11   :  { %117 = dma.hbm_to_vmem [thread:$0]  %s110_s30, 1024, %s112_s1, [#allocation22], %s2070_s17, %s2070_s17, %s2071_s18  }
  0x12   :  { %s2072_s21 = smov [#allocation24]   ;;  %s35_s9 = sshll.u32 %s2304_s0, 4  ;;  %s36_s9 = int_to_ptr.vmem [resolvable:$true] %s35_s9 }
  0x13   :  { %s137_s22 = sshll.u32 %s2072_s21, 4  ;;  %s2073_s25 = smov 192   ;;  %s138_s22 = int_to_ptr.vmem [resolvable:$true] %s137_s22 }
  0x14   :  { %s2074_s26 = smov 12   ;;  %s53_s28 = sshll.u32 %s2306_s2, 4  ;;  %s54_s28 = int_to_ptr.vmem [resolvable:$true] %s53_s28 }
  0x15   :  { %143 = dma.hbm_to_vmem [thread:$0]  %s136_s20, 3072, %s138_s22, [#allocation25], %s2073_s25, %s2073_s25, %s2074_s26  }
  0x16   :  { %s2075_s11 = smov [#allocation8]   ;;  %s2076_s29 = smov [#allocation14]  }
  0x17   :  { %38 = dma.vmem_to_smem %s36_s9, 16, %s2075_s11, [#allocation11]  }
  0x18   :  { %56 = dma.vmem_to_smem %s54_s28, 16, %s2076_s29, [#allocation13]  }
  0x19   :  { %s62_s0 = sshll.u32 %s2307_s3, 4  ;;  %s75_s19 = sshll.u32 %s2310_s6, 4  ;;  %s63_s0 = int_to_ptr.vmem [resolvable:$true] %s62_s0  ;;  %s76_s19 = int_to_ptr.hbm [resolvable:$true] %s75_s19 }
  0x1a   :  { %s2077_s21 = smov [#allocation15]   ;;  %s2078_s20 = smov [#allocation17]  }
  0x1b   :  { %65 = dma.vmem_to_smem %s63_s0, 16, %s2077_s21, [#allocation16]  }
  0x1c   :  { %s77_s22 = sshll.u32 %s2078_s20, 4  ;;  %s96_s24 = sshll.u32 %s2312_s8, 4  ;;  %s78_s22 = int_to_ptr.vmem [resolvable:$true] %s77_s22  ;;  %s97_s24 = int_to_ptr.hbm [resolvable:$true] %s96_s24 }
  0x1d   :  { %80 = dma.hbm_to_vmem [thread:$0]  %s76_s19, 128, %s78_s22, [#allocation9]  }
  0x1e   :  { %s122_s3 = sshll.u32 %s2314_s10, 4  ;;  %s2079_s27 = smov [#allocation20]   ;;  %s123_s3 = int_to_ptr.hbm [resolvable:$true] %s122_s3 }
  0x1f   :  { %s98_s28 = sshll.u32 %s2079_s27, 4  ;;  %s2080_s6 = smov [#allocation23]   ;;  %s99_s28 = int_to_ptr.vmem [resolvable:$true] %s98_s28 }
  0x20   :  { %104 = dma.hbm_to_vmem [thread:$0]  %s97_s24, 1024, %s99_s28, [#allocation19], %s2070_s17, %s2070_s17, %s2071_s18  }
  0x21   :  { %s124_s11 = sshll.u32 %s2080_s6, 4  ;;  %s148_s8 = sshll.u32 %s2316_s12, 4  ;;  %s125_s11 = int_to_ptr.vmem [resolvable:$true] %s124_s11  ;;  %s149_s8 = int_to_ptr.hbm [resolvable:$true] %s148_s8 }
  0x22   :  { %130 = dma.hbm_to_vmem [thread:$0]  %s123_s3, 3072, %s125_s11, [#allocation22], %s2073_s25, %s2073_s25, %s2074_s26  }
  0x23   :  { %s161_s0 = sshll.u32 %s2317_s13, 4  ;;  %s2081_s1 = smov [#allocation26]   ;;  %s162_s0 = int_to_ptr.hbm [resolvable:$true] %s161_s0 }
  0x24   :  { %s150_s7 = sshll.u32 %s2081_s1, 4  ;;  %s2082_s19 = smov [#allocation27]   ;;  %s151_s7 = int_to_ptr.vmem [resolvable:$true] %s150_s7 }
  0x25   :  { %156 = dma.hbm_to_vmem [thread:$0]  %s149_s8, 1024, %s151_s7, [#allocation25], %s2070_s17, %s2070_s17, %s2071_s18  }
  0x26   :  { %s163_s12 = sshll.u32 %s2082_s19, 4  ;;  %s164_s12 = int_to_ptr.vmem [resolvable:$true] %s163_s12 }
  0x27   :  { %169 = dma.hbm_to_vmem [thread:$0]  %s162_s0, 1024, %s164_s12, [#allocation28], %s2070_s17, %s2070_s17, %s2071_s18  }
  0x28   :  { %2037 = dma.done.wait [#allocation11], 16  }
  0x29   :  { %2038 = vsyncadd [#allocation11], 4294967280 }
  0x2a   :  { %2039 = dma.done.wait [#allocation13], 32  }
  0x2b   :  { %2040 = vsyncadd [#allocation13], 4294967264 }
  0x2c   :  { %2041 = dma.done.wait [#allocation16], 16  }
  0x2d   :  { %2042 = vsyncadd [#allocation16], 4294967280 }
  0x2e   :  { %2043 = dma.done.wait [#allocation9], 128  }
  0x2f   :  { %2044 = vsyncadd [#allocation9], 4294967168 }
  0x30   :  { %2045 = dma.done.wait [#allocation19], 1152  }
  0x31   :  { %2046 = vsyncadd [#allocation19], 4294966144 }
  0x32   :  { %2047 = dma.done.wait [#allocation22], 4096  }
  0x33   :  { %2048 = vsyncadd [#allocation22], 4294963200 }
  0x34   :  { %2049 = dma.done.wait [#allocation25], 4096  }
  0x35   :  { %2050 = vsyncadd [#allocation25], 4294963200 }
  0x36   :  { %2051 = dma.done.wait [#allocation28], 1024  }
  0x37   :  { %2052 = vsyncadd [#allocation28], 4294966272 }
  0x38   :  { %220 = sfence }
  0x39   :  { %s2055_s13 = smov 0  }
  0x3a LB: > { %s227_s17 = sld [smem:[#allocation8 + %s2057_s13]]  ;;  %s230_s25 = scalar_lea.vmem [#allocation2], %s2057_s13  ;;  %s2057_s13 = sphi %s2055_s13, %s226_s13  }
  0x3b   : > { %s226_s13 = sadd.s32 1, %s2057_s13  }
  0x3c   : > { %p223_p0 = scmp.ge.s32.totalorder %s226_s13, 16  }
  0x3d   :  { %s2059_s26 = smov (%p223_p0), 0  }
  0x3e   :  { %225 = sbr.rel (!%p223_p0) target bundleno = 58 (0x3a), region = 157 }
  0x40   : > { %s228_s18 = scalar_lea.vmem [#allocation17], %s227_s17 }
  0x41   : > { %v229_v0 = vld [vmem:[%s228_s18] sm:$0x1] }
  0x42   : > { %231 = vst [vmem:[%s230_s25] sm:$0x1] %v229_v0 }
  0x43 LB: > { %s238_s21 = sld [smem:[#allocation14 + %s2061_s26]]  ;;  %s241_s2 = scalar_lea.vmem [#allocation3], %s2061_s26  ;;  %s2061_s26 = sphi %s2059_s26, %s237_s26  }
  0x44   : > { %s243_s20 = sld [smem:[#allocation12 + %s2061_s26]]  ;;  %s246_s24 = scalar_lea.vmem [#allocation4], %s2061_s26 }
  0x45   : > { %s237_s26 = sadd.s32 1, %s2061_s26  }
  0x46   : > { %p234_p1 = scmp.ge.s32.totalorder %s237_s26, 24  }
  0x47   :  { %v1604_v3 = vld [vmem:[#allocation20 + $0x38] sm:$0xff] (%p234_p1)  ;;  %v1603_v4 = vld [vmem:[#allocation20 + $0x30] sm:$0xff] (%p234_p1)  ;;  %v1602_v5 = vld [vmem:[#allocation20 + $0x28] sm:$0xff] (%p234_p1)  ;;  %v2083_v39 = vmov (%p234_p1), 0.0   ;;  %s2063_s3 = smov (%p234_p1), 0  }
  0x48   :  { %236 = sbr.rel (!%p234_p1) target bundleno = 67 (0x43), region = 168  ;;  %320 = vmatpush.bf16.msra.mxu0 (%p234_p1), %v1604_v3  ;;  %v1601_v6 = vld [vmem:[#allocation20 + $0x20] sm:$0xff] (%p234_p1)  ;;  %v1600_v7 = vld [vmem:[#allocation20 + $0x18] sm:$0xff] (%p234_p1)  ;;  %v1599_v9 = vld [vmem:[#allocation20 + $0x10] sm:$0xff] (%p234_p1)  ;;  %430 = vst [vmem:[#allocation6] sm:$0xff] (%p234_p1), %v2083_v39 }
  0x49   : > { %s239_s22 = scalar_lea.vmem [#allocation2], %s238_s21  ;;  %v1612_v8 = vld [vmem:[#allocation21 + $0x38] sm:$0xff] (%p234_p1)  ;;  %v1611_v10 = vld [vmem:[#allocation21 + $0x30] sm:$0xff] (%p234_p1)  ;;  %v1598_v11 = vld [vmem:[#allocation20 + $0x8] sm:$0xff] (%p234_p1)  ;;  %431 = vst [vmem:[#allocation6 + $0x8] sm:$0xff] (%p234_p1), %v2083_v39 }
  0x4a   : > { %v240_v1 = vld [vmem:[%s239_s22] sm:$0x1]  ;;  %s244_s23 = scalar_lea.vmem [#allocation18], %s243_s20  ;;  %409 = vmatpush.bf16.msra.mxu1 (%p234_p1), %v1612_v8  ;;  %v1597_v13 = vld [vmem:[#allocation20] sm:$0xff] (%p234_p1)  ;;  %v1608_v20 = vld [vmem:[#allocation21 + $0x18] sm:$0xff] (%p234_p1) }
  0x4b   : > { %242 = vst [vmem:[%s241_s2] sm:$0x1] %v240_v1  ;;  %v245_v2 = vld [vmem:[%s244_s23] sm:$0x1]  ;;  %v1609_v16 = vld [vmem:[#allocation21 + $0x20] sm:$0xff] (%p234_p1)  ;;  %v1607_v21 = vld [vmem:[#allocation21 + $0x10] sm:$0xff] (%p234_p1) }
  0x4c   : > { %247 = vst [vmem:[%s246_s24] sm:$0x1] %v245_v2  ;;  %321 = vmatpush.bf16.msra.mxu0 (%p234_p1), %v1603_v4  ;;  %v1610_v12 = vld [vmem:[#allocation21 + $0x28] sm:$0xff] (%p234_p1)  ;;  %v1605_v23 = vld [vmem:[#allocation21] sm:$0xff] (%p234_p1) }
  0x4d   :  { %v1606_v22 = vld [vmem:[#allocation21 + $0x8] sm:$0xff] }
  0x4e   :  { %410 = vmatpush.bf16.msra.mxu1 %v1611_v10  ;;  %v1720_v40 = vld [vmem:[%s2318_s14] ss:$0 sm:$0xff] }
  0x50   :  { %322 = vmatpush.bf16.msra.mxu0 %v1602_v5 }
  0x52   :  { %v248_v14 = vld [vmem:[#allocation3] sm:$0xff]  ;;  %v249_v15 = vld [vmem:[#allocation3 + $0x8] sm:$0xff]  ;;  %411 = vmatpush.bf16.msra.mxu1 %v1610_v12  ;;  %v250_v18 = vld [vmem:[#allocation3 + $0x10] sm:$0xff] }
  0x53   :  { %v251_v17 = vpack.c.bf16 %v249_v15, %v248_v14  ;;  %v252_v19 = vpack.c.bf16 %v250_v18, %v250_v18  ;;  %v269_v25 = vld [vmem:[#allocation4] sm:$0xff]  ;;  %v270_v26 = vld [vmem:[#allocation4 + $0x8] sm:$0xff]  ;;  %v271_v33 = vld [vmem:[#allocation4 + $0x10] sm:$0xff] }
  0x54   :  { %323 = vmatpush.bf16.msra.mxu0 %v1601_v6 }
  0x56   :  { %412 = vmatpush.bf16.msra.mxu1 %v1609_v16 }
  0x58   :  { %324 = vmatpush.bf16.msra.mxu0 %v1600_v7 }
  0x5a   :  { %413 = vmatpush.bf16.msra.mxu1 %v1608_v20 }
  0x5c   :  { %325 = vmatpush.bf16.msra.mxu0 %v1599_v9 }
  0x5e   :  { %414 = vmatpush.bf16.msra.mxu1 %v1607_v21 }
  0x60   :  { %326 = vmatpush.bf16.msra.mxu0 %v1598_v11 }
  0x62   :  { %415 = vmatpush.bf16.msra.mxu1 %v1606_v22 }
  0x64   :  { %327 = vmatpush.bf16.msra.mxu0 %v1597_v13 }
  0x66   :  { %416 = vmatpush.bf16.msra.mxu1 %v1605_v23 }
  0x67   :  { %328 = vmatmul.bf16.vlgmr.msra.gmra.mxu0 %v251_v17 }
  0x77   :  { %333 = vmatmul.bf16.gmra.mxu0 %v252_v19 }
  0xe4   :  { %v329_v24 = vpop.f32.mrf.mxu0 }
  0xe5   :  { %v330_v27 = vadd.f32 %v329_v24, %v269_v25 }
  0xe7   :  { %v338_v30 = vmax.f32 %v330_v27, 0.0 }
  0xec   :  { %v331_v28 = vpop.f32.mrf.mxu0 }
  0xed   :  { %v332_v29 = vadd.f32 %v331_v28, %v270_v26 }
  0xef   :  { %v339_v31 = vmax.f32 %v332_v29, 0.0 }
  0xf1   :  { %v341_v32 = vpack.c.bf16 %v339_v31, %v338_v30 }
  0xf3   :  { %417 = vmatmul.bf16.vlgmr.msra.gmra.mxu1 %v341_v32 }
  0xf4   :  { %v334_v34 = vpop.f32.mrf.mxu0 }
  0xf5   :  { %v335_v35 = vadd.f32 %v334_v34, %v271_v33 }
  0xf7   :  { %v340_v36 = vmax.f32 %v335_v35, 0.0 }
  0xf9   :  { %v342_v38 = vpack.c.bf16 %v340_v36, %v340_v36 }
  0xfc   :  { %v336_v37 = vpop.f32.mrf.mxu0 }
 0x103   :  { %422 = vmatmul.bf16.gmra.mxu1 %v342_v38 }
 0x170   :  { %v418_v41 = vpop.f32.mrf.mxu1 }
 0x171   :  { %v419_v42 = vadd.f32 %v1720_v40, %v418_v41 }
 0x173   :  { %427 = vst [vmem:[#allocation5] sm:$0xff] %v419_v42 }
 0x178   :  { %v420_v43 = vpop.f32.mrf.mxu1 }
 0x179   :  { %v421_v44 = vadd.f32 %v1720_v40, %v420_v43 }
 0x17b   :  { %428 = vst [vmem:[#allocation5 + $0x8] sm:$0xff] %v421_v44 }
 0x180   :  { %v423_v45 = vpop.f32.mrf.mxu1 }
 0x181   :  { %v424_v46 = vadd.f32 %v1720_v40, %v423_v45 }
 0x183   :  { %429 = vst [vmem:[#allocation5 + $0x10] sm:$0xff] %v424_v46 }
 0x188   :  { %v425_v47 = vpop.f32.mrf.mxu1 }
 0x189 LB: > { %s438_s27 = sld [smem:[#allocation15 + %s2065_s3]]  ;;  %s441_s28 = scalar_lea.vmem [#allocation5], %s2065_s3  ;;  %s2065_s3 = sphi %s2063_s3, %s437_s3  }
 0x18a   : > { %v442_v48 = vld [vmem:[%s441_s28] sm:$0x1]  ;;  %s437_s3 = sadd.s32 1, %s2065_s3  }
 0x18b   : > { %p434_p2 = scmp.ge.s32.totalorder %s437_s3, 24  }
 0x18c   :  { %v1421_v51 = vld [vmem:[#allocation23 + $0xa8] sm:$0xf] (%p434_p2)  ;;  %v1635_v52 = vld [vmem:[#allocation23 + $0xb0] sm:$0xf0] (%p434_p2)  ;;  %v1634_v53 = vld [vmem:[#allocation23 + $0xac] sm:$0xf] (%p434_p2) }
 0x18d   :  { %v1422_v54 = vor.u32 (%p434_p2), %v1635_v52, %v1421_v51  ;;  %v1423_v55 = vld [vmem:[#allocation23 + $0xb4] sm:$0xf0] (%p434_p2)  ;;  %v1409_v56 = vld [vmem:[#allocation23 + $0x90] sm:$0xf] (%p434_p2)  ;;  %v1632_v57 = vld [vmem:[#allocation23 + $0x98] sm:$0xf0] (%p434_p2) }
 0x18e   :  { %v1426_v58 = vor.u32 (%p434_p2), %v1634_v53, %v1423_v55  ;;  %v1631_v59 = vld [vmem:[#allocation23 + $0x94] sm:$0xf] (%p434_p2)  ;;  %v1411_v60 = vld [vmem:[#allocation23 + $0x9c] sm:$0xf0] (%p434_p2)  ;;  %v1410_v61 = vor.u32 (%p434_p2), %v1632_v57, %v1409_v56  ;;  %v1517_v62 = vld [vmem:[#allocation24 + $0xa8] sm:$0xf] (%p434_p2) }
 0x18f   : > { %s439_s6 = scalar_lea.vmem [#allocation6], %s438_s27  ;;  %436 = sbr.rel (!%p434_p2) target bundleno = 393 (0x189), region = 179  ;;  %610 = vmatpush.bf16.msra.mxu2 (%p434_p2), %v1422_v54  ;;  %v1659_v63 = vld [vmem:[#allocation24 + $0xb0] sm:$0xf0] (%p434_p2)  ;;  %v1414_v0 = vor.u32 (%p434_p2), %v1631_v59, %v1411_v60  ;;  %v1397_v1 = vld [vmem:[#allocation23 + $0x78] sm:$0xf] (%p434_p2) }
 0x190   : > { %v440_v49 = vld [vmem:[%s439_s6] sm:$0x1]  ;;  %624 = vmatpush.bf16.msra.mxu3 (%p434_p2), %v1426_v58  ;;  %v1629_v2 = vld [vmem:[#allocation23 + $0x80] sm:$0xf0] (%p434_p2)  ;;  %v1518_v3 = vor.u32 (%p434_p2), %v1659_v63, %v1517_v62  ;;  %v1628_v4 = vld [vmem:[#allocation23 + $0x7c] sm:$0xf] (%p434_p2) }
 0x191   : > { %v443_v50 = vadd.f32 %v442_v48, %v440_v49  ;;  %v1399_v5 = vld [vmem:[#allocation23 + $0x84] sm:$0xf0] (%p434_p2)  ;;  %v1505_v6 = vld [vmem:[#allocation24 + $0x90] sm:$0xf] (%p434_p2)  ;;  %v1656_v7 = vld [vmem:[#allocation24 + $0x98] sm:$0xf0] (%p434_p2)  ;;  %v1398_v9 = vor.u32 (%p434_p2), %v1629_v2, %v1397_v1 }
 0x192   :  { %813 = vmatpush.bf16.msrb.mxu1 (%p434_p2), %v1518_v3  ;;  %v1506_v8 = vor.u32 (%p434_p2), %v1656_v7, %v1505_v6  ;;  %v1493_v10 = vld [vmem:[#allocation24 + $0x78] sm:$0xf] (%p434_p2)  ;;  %v1653_v11 = vld [vmem:[#allocation24 + $0x80] sm:$0xf0] (%p434_p2)  ;;  %v1402_v12 = vor.u32 (%p434_p2), %v1628_v4, %v1399_v5  ;;  %v1385_v13 = vld [vmem:[#allocation23 + $0x60] sm:$0xf] (%p434_p2) }
 0x193   : > { %444 = vst [vmem:[%s439_s6] sm:$0x1] %v443_v50  ;;  %611 = vmatpush.bf16.msra.mxu2 (%p434_p2), %v1410_v61  ;;  %v1626_v14 = vld [vmem:[#allocation23 + $0x68] sm:$0xf0] (%p434_p2)  ;;  %v1625_v15 = vld [vmem:[#allocation23 + $0x64] sm:$0xf] (%p434_p2)  ;;  %v1494_v17 = vor.u32 (%p434_p2), %v1653_v11, %v1493_v10  ;;  %s1231_s6 = sshll.u32 (%p434_p2), %s2319_s15, 4  ;;  %s1232_s6 = int_to_ptr.hbm [resolvable:$true] %s1231_s6 }
 0x194   :  { %625 = vmatpush.bf16.msra.mxu3 %v1414_v0  ;;  %v1387_v16 = vld [vmem:[#allocation23 + $0x6c] sm:$0xf0]  ;;  %v1386_v18 = vor.u32 %v1626_v14, %v1385_v13  ;;  %v1481_v19 = vld [vmem:[#allocation24 + $0x60] sm:$0xf]  ;;  %v1650_v20 = vld [vmem:[#allocation24 + $0x68] sm:$0xf0] }
 0x195   :  { %v1390_v21 = vor.u32 %v1625_v15, %v1387_v16  ;;  %v1373_v22 = vld [vmem:[#allocation23 + $0x48] sm:$0xf]  ;;  %v1623_v23 = vld [vmem:[#allocation23 + $0x50] sm:$0xf0]  ;;  %v1622_v24 = vld [vmem:[#allocation23 + $0x4c] sm:$0xf]  ;;  %v1482_v26 = vor.u32 %v1650_v20, %v1481_v19 }
 0x196   :  { %814 = vmatpush.bf16.msrb.mxu1 %v1506_v8  ;;  %v1375_v25 = vld [vmem:[#allocation23 + $0x54] sm:$0xf0]  ;;  %v1374_v27 = vor.u32 %v1623_v23, %v1373_v22  ;;  %v1469_v28 = vld [vmem:[#allocation24 + $0x48] sm:$0xf]  ;;  %v1647_v29 = vld [vmem:[#allocation24 + $0x50] sm:$0xf0] }
 0x197   :  { %612 = vmatpush.bf16.msra.mxu2 %v1398_v9  ;;  %v1378_v30 = vor.u32 %v1622_v24, %v1375_v25  ;;  %v1361_v31 = vld [vmem:[#allocation23 + $0x30] sm:$0xf]  ;;  %v1620_v32 = vld [vmem:[#allocation23 + $0x38] sm:$0xf0]  ;;  %v1619_v33 = vld [vmem:[#allocation23 + $0x34] sm:$0xf]  ;;  %v1470_v35 = vor.u32 %v1647_v29, %v1469_v28 }
 0x198   :  { %626 = vmatpush.bf16.msra.mxu3 %v1402_v12  ;;  %v1363_v34 = vld [vmem:[#allocation23 + $0x3c] sm:$0xf0]  ;;  %v1362_v36 = vor.u32 %v1620_v32, %v1361_v31  ;;  %v1457_v37 = vld [vmem:[#allocation24 + $0x30] sm:$0xf]  ;;  %v1644_v38 = vld [vmem:[#allocation24 + $0x38] sm:$0xf0] }
 0x199   :  { %v1366_v39 = vor.u32 %v1619_v33, %v1363_v34  ;;  %v1349_v40 = vld [vmem:[#allocation23 + $0x18] sm:$0xf]  ;;  %v1617_v41 = vld [vmem:[#allocation23 + $0x20] sm:$0xf0]  ;;  %v1429_v42 = vld [vmem:[#allocation23 + $0xb0] sm:$0xf]  ;;  %v1458_v47 = vor.u32 %v1644_v38, %v1457_v37 }
 0x19a   :  { %815 = vmatpush.bf16.msrb.mxu1 %v1494_v17  ;;  %v1616_v43 = vld [vmem:[#allocation23 + $0x1c] sm:$0xf]  ;;  %v1351_v44 = vld [vmem:[#allocation23 + $0x24] sm:$0xf0]  ;;  %v1337_v46 = vld [vmem:[#allocation23] sm:$0xf]  ;;  %v1350_v50 = vor.u32 %v1617_v41, %v1349_v40 }
 0x19b   :  { %613 = vmatpush.bf16.msra.mxu2 %v1386_v18  ;;  %v1636_v45 = vld [vmem:[#allocation23 + $0xb8] sm:$0xf0]  ;;  %v1417_v49 = vld [vmem:[#allocation23 + $0x98] sm:$0xf]  ;;  %v1641_v52 = vld [vmem:[#allocation24 + $0x20] sm:$0xf0]  ;;  %v1354_v54 = vor.u32 %v1616_v43, %v1351_v44 }
 0x19c   :  { %627 = vmatpush.bf16.msra.mxu3 %v1390_v21  ;;  %v1430_v48 = vor.u32 %v1636_v45, %v1429_v42  ;;  %v1445_v51 = vld [vmem:[#allocation24 + $0x18] sm:$0xf]  ;;  %v1633_v53 = vld [vmem:[#allocation23 + $0xa0] sm:$0xf0]  ;;  %v1614_v55 = vld [vmem:[#allocation23 + $0x8] sm:$0xf0] }
 0x19d   :  { %v1658_v56 = vld [vmem:[#allocation24 + $0xac] sm:$0xf]  ;;  %v1519_v57 = vld [vmem:[#allocation24 + $0xb4] sm:$0xf0]  ;;  %v1418_v58 = vor.u32 %v1633_v53, %v1417_v49  ;;  %v447_v59 = vld [vmem:[#allocation6] sm:$0xff]  ;;  %v1446_v63 = vor.u32 %v1641_v52, %v1445_v51  ;;  %v1338_v3 = vor.u32 %v1614_v55, %v1337_v46 }
 0x19e   :  { %816 = vmatpush.bf16.msrb.mxu1 %v1482_v26  ;;  %638 = vmatpush.bf16.msrb.mxu0 %v1430_v48  ;;  %v1613_v60 = vld [vmem:[#allocation23 + $0x4] sm:$0xf]  ;;  %v1339_v61 = vld [vmem:[#allocation23 + $0xc] sm:$0xf0]  ;;  %v1660_v0 = vld [vmem:[#allocation24 + $0xb8] sm:$0xf0]  ;;  %v1522_v7 = vor.u32 %v1658_v56, %v1519_v57 }
 0x19f   :  { %614 = vmatpush.bf16.msra.mxu2 %v1374_v27  ;;  %v1525_v62 = vld [vmem:[#allocation24 + $0xb0] sm:$0xf]  ;;  %v1405_v1 = vld [vmem:[#allocation23 + $0x80] sm:$0xf]  ;;  %v1630_v2 = vld [vmem:[#allocation23 + $0x88] sm:$0xf0]  ;;  %v1342_v8 = vor.u32 %v1613_v60, %v1339_v61 }
 0x1a0   :  { %628 = vmatpush.bf16.msra.mxu3 %v1378_v30  ;;  %v448_v4 = vld [vmem:[#allocation6 + $0x8] sm:$0xff]  ;;  %v1433_v5 = vld [vmem:[#allocation24] sm:$0xf]  ;;  %v1526_v9 = vor.u32 %v1660_v0, %v1525_v62  ;;  %v1655_v10 = vld [vmem:[#allocation24 + $0x94] sm:$0xf]  ;;  %v1406_v13 = vor.u32 %v1630_v2, %v1405_v1 }
 0x1a1   :  { %v1638_v6 = vld [vmem:[#allocation24 + $0x8] sm:$0xf0]  ;;  %v1507_v11 = vld [vmem:[#allocation24 + $0x9c] sm:$0xf0]  ;;  %v1513_v12 = vld [vmem:[#allocation24 + $0x98] sm:$0xf]  ;;  %v2226_v14 = vpack.c.bf16 %v448_v4, %v447_v59 }
 0x1a2   :  { %817 = vmatpush.bf16.msrb.mxu1 %v1470_v35  ;;  %639 = vmatpush.bf16.msrb.mxu0 %v1418_v58  ;;  %v1434_v15 = vor.u32 %v1638_v6, %v1433_v5  ;;  %v1657_v16 = vld [vmem:[#allocation24 + $0xa0] sm:$0xf0]  ;;  %v2228_v17 = vld [vmem:[#allocation2] sm:$0xff]  ;;  %v2230_v18 = vld [vmem:[#allocation2 + $0x8] sm:$0xff]  ;;  %v1510_v22 = vor.u32 %v1655_v10, %v1507_v11 }
 0x1a3   :  { %615 = vmatpush.bf16.msra.mxu2 %v1362_v36  ;;  %v1652_v19 = vld [vmem:[#allocation24 + $0x7c] sm:$0xf]  ;;  %v1393_v20 = vld [vmem:[#allocation23 + $0x68] sm:$0xf]  ;;  %v1627_v21 = vld [vmem:[#allocation23 + $0x70] sm:$0xf0]  ;;  %v1514_v26 = vor.u32 %v1657_v16, %v1513_v12  ;;  %v2234_v27 = vpack.c.bf16 %v2230_v18, %v2228_v17 }
 0x1a4   :  { %629 = vmatpush.bf16.msra.mxu3 %v1366_v39  ;;  %v1495_v23 = vld [vmem:[#allocation24 + $0x84] sm:$0xf0]  ;;  %v1501_v24 = vld [vmem:[#allocation24 + $0x80] sm:$0xf]  ;;  %v1654_v25 = vld [vmem:[#allocation24 + $0x88] sm:$0xf0]  ;;  %v1394_v30 = vor.u32 %v1627_v21, %v1393_v20 }
 0x1a5   :  { %v1381_v28 = vld [vmem:[#allocation23 + $0x50] sm:$0xf]  ;;  %v1624_v29 = vld [vmem:[#allocation23 + $0x58] sm:$0xf0]  ;;  %v1498_v31 = vor.u32 %v1652_v19, %v1495_v23  ;;  %v1502_v32 = vor.u32 %v1654_v25, %v1501_v24  ;;  %v1649_v33 = vld [vmem:[#allocation24 + $0x64] sm:$0xf] }
 0x1a6   :  { %818 = vmatpush.bf16.msrb.mxu1 %v1458_v47  ;;  %640 = vmatpush.bf16.msrb.mxu0 %v1406_v13  ;;  %v1483_v34 = vld [vmem:[#allocation24 + $0x6c] sm:$0xf0]  ;;  %v1489_v35 = vld [vmem:[#allocation24 + $0x68] sm:$0xf]  ;;  %v1651_v36 = vld [vmem:[#allocation24 + $0x70] sm:$0xf0]  ;;  %v1382_v37 = vor.u32 %v1624_v29, %v1381_v28 }
 0x1a7   :  { %616 = vmatpush.bf16.msra.mxu2 %v1350_v50  ;;  %v1369_v38 = vld [vmem:[#allocation23 + $0x38] sm:$0xf]  ;;  %v1621_v39 = vld [vmem:[#allocation23 + $0x40] sm:$0xf0]  ;;  %v1486_v40 = vor.u32 %v1649_v33, %v1483_v34  ;;  %v1490_v41 = vor.u32 %v1651_v36, %v1489_v35  ;;  %v1646_v42 = vld [vmem:[#allocation24 + $0x4c] sm:$0xf] }
 0x1a8   :  { %630 = vmatpush.bf16.msra.mxu3 %v1354_v54  ;;  %v1471_v43 = vld [vmem:[#allocation24 + $0x54] sm:$0xf0]  ;;  %v1477_v44 = vld [vmem:[#allocation24 + $0x50] sm:$0xf]  ;;  %v1648_v45 = vld [vmem:[#allocation24 + $0x58] sm:$0xf0]  ;;  %v1370_v46 = vor.u32 %v1621_v39, %v1369_v38 }
 0x1a9   :  { %v1357_v47 = vld [vmem:[#allocation23 + $0x20] sm:$0xf]  ;;  %v1618_v48 = vld [vmem:[#allocation23 + $0x28] sm:$0xf0]  ;;  %v1474_v49 = vor.u32 %v1646_v42, %v1471_v43  ;;  %v1478_v50 = vor.u32 %v1648_v45, %v1477_v44  ;;  %v1643_v51 = vld [vmem:[#allocation24 + $0x34] sm:$0xf] }
 0x1aa   :  { %819 = vmatpush.bf16.msrb.mxu1 %v1446_v63  ;;  %641 = vmatpush.bf16.msrb.mxu0 %v1394_v30  ;;  %v1459_v52 = vld [vmem:[#allocation24 + $0x3c] sm:$0xf0]  ;;  %v1465_v53 = vld [vmem:[#allocation24 + $0x38] sm:$0xf]  ;;  %v1645_v54 = vld [vmem:[#allocation24 + $0x40] sm:$0xf0]  ;;  %v1358_v55 = vor.u32 %v1618_v48, %v1357_v47 }
 0x1ab   :  { %617 = vmatpush.bf16.msra.mxu2 %v1338_v3  ;;  %v1345_v56 = vld [vmem:[#allocation23 + $0x8] sm:$0xf]  ;;  %v1615_v57 = vld [vmem:[#allocation23 + $0x10] sm:$0xf0]  ;;  %v1462_v58 = vor.u32 %v1643_v51, %v1459_v52  ;;  %v1466_v59 = vor.u32 %v1645_v54, %v1465_v53  ;;  %v1640_v60 = vld [vmem:[#allocation24 + $0x1c] sm:$0xf] }
 0x1ac   :  { %631 = vmatpush.bf16.msra.mxu3 %v1342_v8  ;;  %v1447_v61 = vld [vmem:[#allocation24 + $0x24] sm:$0xf0]  ;;  %v1453_v62 = vld [vmem:[#allocation24 + $0x20] sm:$0xf]  ;;  %v1642_v63 = vld [vmem:[#allocation24 + $0x28] sm:$0xf0]  ;;  %v1346_v0 = vor.u32 %v1615_v57, %v1345_v56 }
 0x1ad   :  { %v1450_v1 = vor.u32 %v1640_v60, %v1447_v61  ;;  %v1454_v2 = vor.u32 %v1642_v63, %v1453_v62  ;;  %v1637_v3 = vld [vmem:[#allocation24 + $0x4] sm:$0xf]  ;;  %v1435_v4 = vld [vmem:[#allocation24 + $0xc] sm:$0xf0]  ;;  %v1441_v5 = vld [vmem:[#allocation24 + $0x8] sm:$0xf] }
 0x1ae   :  { %618 = vmatmul.bf16.vlgmr.msra.gmra.mxu2 %v2226_v14  ;;  %820 = vmatpush.bf16.msrb.mxu1 %v1434_v15  ;;  %v1639_v6 = vld [vmem:[#allocation24 + $0x10] sm:$0xf0]  ;;  %v1724_v13 = vld [vmem:[%s2318_s14 + $0x4] ss:$0 sm:$0xff]  ;;  %v1672_v36 = vld [vmem:[#allocation27 + $0x18] sm:$0xff] }
 0x1af   :  { %827 = vmatpush.bf16.msrb.mxu2 %v1522_v7  ;;  %632 = vmatmul.bf16.vlgmr.msra.gmra.mxu3 %v2226_v14  ;;  %v1438_v7 = vor.u32 %v1637_v3, %v1435_v4  ;;  %v1442_v8 = vor.u32 %v1639_v6, %v1441_v5  ;;  %v1675_v23 = vld [vmem:[#allocation27 + $0x30] sm:$0xff]  ;;  %v1674_v28 = vld [vmem:[#allocation27 + $0x28] sm:$0xff]  ;;  %v1664_v45 = vld [vmem:[#allocation26 + $0x18] sm:$0xff] }
 0x1b0   :  { %841 = vmatpush.bf16.msrb.mxu3 %v1526_v9  ;;  %642 = vmatpush.bf16.msrb.mxu0 %v1382_v37  ;;  %v1723_v9 = vld [vmem:[%s2318_s14 + $0x1] ss:$0 sm:$0xff]  ;;  %v1725_v37 = vld [vmem:[%s2318_s14 + $0x2] ss:$0 sm:$0xff]  ;;  %v1726_v43 = vld [vmem:[%s2318_s14 + $0x5] ss:$0 sm:$0xff] }
 0x1b1   :  { %821 = vmatmul.bf16.vlgmr.msrb.gmra.mxu1 %v2234_v27  ;;  %v1666_v35 = vld [vmem:[#allocation26 + $0x28] sm:$0xff]  ;;  %v1669_v51 = vld [vmem:[#allocation27] sm:$0xff] }
 0x1b2   :  { %v1662_v57 = vld [vmem:[#allocation26 + $0x8] sm:$0xff]  ;;  %v1661_v63 = vld [vmem:[#allocation26] sm:$0xff] }
 0x1b3   :  { %828 = vmatpush.bf16.msrb.mxu2 %v1510_v22 }
 0x1b4   :  { %842 = vmatpush.bf16.msrb.mxu3 %v1514_v26  ;;  %643 = vmatpush.bf16.msrb.mxu0 %v1370_v46  ;;  %v1668_v26 = vld [vmem:[#allocation26 + $0x38] sm:$0xff]  ;;  %v1670_v46 = vld [vmem:[#allocation27 + $0x8] sm:$0xff] }
 0x1b7   :  { %829 = vmatpush.bf16.msrb.mxu2 %v1498_v31  ;;  %v1667_v31 = vld [vmem:[#allocation26 + $0x30] sm:$0xff] }
 0x1b8   :  { %843 = vmatpush.bf16.msrb.mxu3 %v1502_v32  ;;  %644 = vmatpush.bf16.msrb.mxu0 %v1358_v55  ;;  %v1673_v32 = vld [vmem:[#allocation27 + $0x20] sm:$0xff] }
 0x1bb   :  { %830 = vmatpush.bf16.msrb.mxu2 %v1486_v40  ;;  %v1665_v40 = vld [vmem:[#allocation26 + $0x20] sm:$0xff] }
 0x1bc   :  { %844 = vmatpush.bf16.msrb.mxu3 %v1490_v41  ;;  %645 = vmatpush.bf16.msrb.mxu0 %v1346_v0  ;;  %v1671_v41 = vld [vmem:[#allocation27 + $0x10] sm:$0xff] }
 0x1bf   :  { %831 = vmatpush.bf16.msrb.mxu2 %v1474_v49  ;;  %646 = vmatmul.bf16.vlgmr.msrb.gmra.mxu0 %v2226_v14  ;;  %v1676_v14 = vld [vmem:[#allocation27 + $0x38] sm:$0xff] }
 0x1c0   :  { %845 = vmatpush.bf16.msrb.mxu3 %v1478_v50  ;;  %1122 = vmatpush.bf16.msra.mxu1 %v1676_v14  ;;  %v1663_v50 = vld [vmem:[#allocation26 + $0x10] sm:$0xff] }
 0x1c1   :  { %1040 = vmatpush.bf16.msra.mxu0 %v1668_v26 }
 0x1c3   :  { %832 = vmatpush.bf16.msrb.mxu2 %v1462_v58 }
 0x1c4   :  { %846 = vmatpush.bf16.msrb.mxu3 %v1466_v59  ;;  %1123 = vmatpush.bf16.msra.mxu1 %v1675_v23  ;;  %v1728_v23 = vld [vmem:[%s2318_s14 + $0x3] ss:$0 sm:$0xff] }
 0x1c5   :  { %1041 = vmatpush.bf16.msra.mxu0 %v1667_v31 }
 0x1c7   :  { %833 = vmatpush.bf16.msrb.mxu2 %v1450_v1 }
 0x1c8   :  { %847 = vmatpush.bf16.msrb.mxu3 %v1454_v2  ;;  %1124 = vmatpush.bf16.msra.mxu1 %v1674_v28 }
 0x1c9   :  { %1042 = vmatpush.bf16.msra.mxu0 %v1666_v35 }
 0x1cb   :  { %834 = vmatpush.bf16.msrb.mxu2 %v1438_v7 }
 0x1cc   :  { %848 = vmatpush.bf16.msrb.mxu3 %v1442_v8  ;;  %1125 = vmatpush.bf16.msra.mxu1 %v1673_v32 }
 0x1cd   :  { %1043 = vmatpush.bf16.msra.mxu0 %v1665_v40 }
 0x1ce   :  { %835 = vmatmul.bf16.vlgmr.msrb.gmra.mxu2 %v2234_v27 }
 0x1cf   :  { %849 = vmatmul.bf16.vlgmr.msrb.gmra.mxu3 %v2234_v27 }
 0x1d0   :  { %1126 = vmatpush.bf16.msra.mxu1 %v1672_v36 }
 0x1d1   :  { %1044 = vmatpush.bf16.msra.mxu0 %v1664_v45 }
 0x1d4   :  { %1127 = vmatpush.bf16.msra.mxu1 %v1671_v41 }
 0x1d5   :  { %1045 = vmatpush.bf16.msra.mxu0 %v1663_v50 }
 0x1d8   :  { %1128 = vmatpush.bf16.msra.mxu1 %v1670_v46 }
 0x1d9   :  { %1046 = vmatpush.bf16.msra.mxu0 %v1662_v57 }
 0x1dc   :  { %1129 = vmatpush.bf16.msra.mxu1 %v1669_v51 }
 0x1dd   :  { %1047 = vmatpush.bf16.msra.mxu0 %v1661_v63 }
 0x1df   :  { %1130 = vmatmul.bf16.vlgmr.msra.gmra.mxu1 %v2234_v27 }
 0x22e   :  { %v822_v10 = vpop.f32.mrf.mxu1 }
 0x231   :  { %v619_v11 = vpop.f32.mrf.mxu2 }
 0x232   :  { %v857_v12 = vadd.f32 %v1723_v9, %v619_v11  ;;  %v633_v34 = vpop.f32.mrf.mxu3  ;;  %v1727_v11 = vld [vmem:[%s2318_s14 + $0x6] ss:$0 sm:$0xff] }
 0x233   :  { %v905_v42 = vadd.f32 %v1725_v37, %v633_v34 }
 0x234   :  { %v859_v15 = vadd.f32 %v857_v12, %v822_v10 }
 0x236   :  { %v863_v16 = vadd.f32 %v1724_v13, %v859_v15  ;;  %v824_v21 = vpop.f32.mrf.mxu1 }
 0x238   :  { %v1527_v19 = vmul.f32 -1.442695, %v863_v16 }
 0x239   :  { %v621_v20 = vpop.f32.mrf.mxu2 }
 0x23a   :  { %v858_v22 = vadd.f32 %v1723_v9, %v621_v20  ;;  %1733 = vpow2.f32 %v1527_v19  ;;  %v635_v48 = vpop.f32.mrf.mxu3 }
 0x23b   :  { %v906_v58 = vadd.f32 %v1725_v37, %v635_v48 }
 0x23c   :  { %v860_v24 = vadd.f32 %v858_v22, %v824_v21  ;;  %v647_v8 = vpop.f32.mrf.mxu0 }
 0x23d   :  { %v953_v35 = vadd.f32 %v1728_v23, %v647_v8 }
 0x23e   :  { %v864_v25 = vadd.f32 %v1724_v13, %v860_v24 }
 0x240   :  { %v1528_v29 = vmul.f32 -1.442695, %v864_v25  ;;  %v1734_v30 = vpop.eup %1733 }
 0x241   :  { %v2248_v33 = vadd.f32 1.0, %v1734_v30 }
 0x242   :  { %1735 = vpow2.f32 %v1528_v29 }
 0x243   :  { %1737 = vrcp.f32 %v2248_v33  ;;  %vm878_vm0 = vweird.f32 %v2248_v33  ;;  %v884_v7 = vand.u32 2147483648, %v2248_v33  ;;  %v882_v9 = vand.u32 2147483647, %v2248_v33 }
 0x245   :  { %v885_v13 = vor.u32 1.1754944e-38, %v884_v7  ;;  %vm883_vm4 = vcmp.eq.f32.partialorder %v882_v9, 8.507059e+37  ;;  %v1730_v7 = vld [vmem:[%s2318_s14 + $0xa] ss:$0 sm:$0xff] }
 0x248   :  { %v1736_v38 = vpop.eup %1735 }
 0x249   :  { %v2254_v39 = vadd.f32 1.0, %v1736_v38  ;;  %v1738_v47 = vpop.eup %1737 }
 0x24a   :  { %v874_v54 = vmul.f32 %v1738_v47, %v2248_v33  ;;  %vm879_vm1 = vweird.f32 %v1738_v47  ;;  %v649_v33 = vpop.f32.mrf.mxu0 }
 0x24b   :  { %1739 = vrcp.f32 %v2254_v39  ;;  %vm2266_vm2 = vmor %vm878_vm0, %vm879_vm1  ;;  %v899_v15 = vand.u32 2147483648, %v2254_v39  ;;  %vm893_vm5 = vweird.f32 %v2254_v39  ;;  %v897_v14 = vand.u32 2147483647, %v2254_v39 }
 0x24c   :  { %v875_v59 = vsub.f32 1.0, %v874_v54  ;;  %v954_v38 = vadd.f32 %v1728_v23, %v649_v33 }
 0x24d   :  { %v900_v29 = vor.u32 1.1754944e-38, %v899_v15  ;;  %vm898_vm7 = vcmp.eq.f32.partialorder %v897_v14, 8.507059e+37  ;;  %v1731_v15 = vld [vmem:[%s2318_s14 + $0x7] ss:$0 sm:$0xff] }
 0x24e   :  { %v876_v2 = vmul.f32 %v1738_v47, %v875_v59 }
 0x250   :  { %v877_v27 = vadd.f32 %v1738_v47, %v876_v2 }
 0x251   :  { %v836_v44 = vpop.f32.mrf.mxu2  ;;  %v1740_v52 = vpop.eup %1739 }
 0x252   :  { %v907_v49 = vadd.f32 %v905_v42, %v836_v44  ;;  %v889_v56 = vmul.f32 %v1740_v52, %v2254_v39  ;;  %v850_v0 = vpop.f32.mrf.mxu3  ;;  %vm894_vm3 = vweird.f32 %v1740_v52  ;;  %v881_v16 = vsel %vm2266_vm2, %v1738_v47, %v877_v27 }
 0x253   :  { %vm895_vm6 = vmor %vm893_vm5, %vm894_vm3  ;;  %v957_v22 = vadd.f32 %v1727_v11, %v850_v0  ;;  %v886_v28 = vsel %vm883_vm4, %v885_v13, %v881_v16  ;;  %v1199_v13 = vld [vmem:[%s2309_s5 + $0x8] sm:$0xff] }
 0x254   :  { %v911_v53 = vadd.f32 %v1726_v43, %v907_v49  ;;  %v890_v62 = vsub.f32 1.0, %v889_v56 }
 0x255   :  { %v959_v34 = vmul.f32 %v957_v22, %v886_v28 }
 0x256   :  { %v1529_v55 = vmul.f32 -1.442695, %v911_v53  ;;  %v891_v6 = vmul.f32 %v1740_v52, %v890_v62 }
 0x258   :  { %1741 = vpow2.f32 %v1529_v55  ;;  %v892_v12 = vadd.f32 %v1740_v52, %v891_v6 }
 0x259   :  { %v838_v60 = vpop.f32.mrf.mxu2 }
 0x25a   :  { %v908_v61 = vadd.f32 %v906_v58, %v838_v60  ;;  %v852_v20 = vpop.f32.mrf.mxu3  ;;  %v896_v25 = vsel %vm895_vm6, %v1740_v52, %v892_v12  ;;  %v2084_v12 = vmov 0  }
 0x25b   :  { %v958_v30 = vadd.f32 %v1727_v11, %v852_v20  ;;  %v901_v32 = vsel %vm898_vm7, %v900_v29, %v896_v25  ;;  %v1198_v11 = vld [vmem:[%s2309_s5] sm:$0xff]  ;;  %1721 = vset.pattern.permute.xlu2 %v2084_v12  ;;  %1722 = vset.pattern.permute.xlu0 %v2084_v12  ;;  %s1156_s5 = sld [smem:[#allocation7]] }
 0x25c   :  { %v912_v1 = vadd.f32 %v1726_v43, %v908_v61  ;;  %v961_v43 = vadd.f32 %v959_v34, %v953_v35  ;;  %1203 = vperm.xlu2 %1721, %v1198_v11  }
 0x25d   :  { %v960_v37 = vmul.f32 %v958_v30, %v901_v32 }
 0x25e   :  { %v1742_v3 = vpop.eup %1741  ;;  %v1530_v4 = vmul.f32 -1.442695, %v912_v1 }
 0x25f   :  { %v919_v5 = vadd.f32 1.0, %v1742_v3  ;;  %v962_v46 = vadd.f32 %v960_v37, %v954_v38 }
 0x260   :  { %1743 = vpow2.f32 %v1530_v4  ;;  %v1729_v4 = vld [vmem:[%s2318_s14 + $0x8] ss:$0 sm:$0xff] }
 0x261   :  { %1745 = vrcp.f32 %v919_v5  ;;  %v932_v39 = vand.u32 2147483648, %v919_v5  ;;  %vm926_vm9 = vweird.f32 %v919_v5  ;;  %v930_v41 = vand.u32 2147483647, %v919_v5 }
 0x262   :  { %v1157_v28 = vstv %s1156_s5 }
 0x263   :  { %v933_v47 = vor.u32 1.1754944e-38, %v932_v39  ;;  %vm931_vm11 = vcmp.eq.f32.partialorder %v930_v41, 8.507059e+37 }
 0x264   :  { %1206 = vperm.xlu2 %1721, %v1199_v13  }
 0x266   :  { %v1744_v19 = vpop.eup %1743 }
 0x267   :  { %v1746_v21 = vpop.eup %1745  ;;  %v920_v24 = vadd.f32 1.0, %v1744_v19  ;;  %v1732_v19 = vld [vmem:[%s2318_s14 + $0x9] ss:$0 sm:$0xff]  ;;  %s2085_s14 = smov [#allocation29]  }
 0x268   :  { %v922_v26 = vmul.f32 %v1746_v21, %v919_v5  ;;  %vm927_vm8 = vweird.f32 %v1746_v21  ;;  %v1131_v5 = vpop.f32.mrf.mxu1  ;;  %s1229_s3 = sshll.u32 %s2085_s14, 4  ;;  %s1230_s3 = int_to_ptr.vmem [resolvable:$true] %s1229_s3 }
 0x269   :  { %1747 = vrcp.f32 %v920_v24  ;;  %vm928_vm10 = vmor %vm926_vm9, %vm927_vm8  ;;  %v947_v50 = vand.u32 2147483648, %v920_v24  ;;  %v945_v52 = vand.u32 2147483647, %v920_v24  ;;  %vm941_vm13 = vweird.f32 %v920_v24 }
 0x26a   :  { %v923_v31 = vsub.f32 1.0, %v922_v26  ;;  %1749 = vtanh.f32 %v961_v43  ;;  %v1132_v6 = vadd.f32 %v1729_v4, %v1131_v5  ;;  %vm1212_vm8 = vcmask 15360  }
 0x26b   :  { %1751 = vtanh.f32 %v962_v46  ;;  %v948_v55 = vor.u32 1.1754944e-38, %v947_v50  ;;  %vm946_vm15 = vcmp.eq.f32.partialorder %v945_v52, 8.507059e+37 }
 0x26c   :  { %v924_v36 = vmul.f32 %v1746_v21, %v923_v31  ;;  %v1136_v8 = vmax.f32 %v1132_v6, 0.0 }
 0x26e   :  { %v925_v40 = vadd.f32 %v1746_v21, %v924_v36  ;;  %v1148_v27 = vmul.f32 %v1730_v7, %v1136_v8 }
 0x26f   :  { %v1748_v42 = vpop.eup %1747 }
 0x270   :  { %v937_v44 = vmul.f32 %v1748_v42, %v920_v24  ;;  %v929_v45 = vsel %vm928_vm10, %v1746_v21, %v925_v40  ;;  %vm942_vm12 = vweird.f32 %v1748_v42  ;;  %v1750_v57 = vpop.eup %1749  ;;  %1150 = vadd.xlane.f32.xlu1 %v1148_v27 }
 0x271   :  { %v934_v49 = vsel %vm931_vm11, %v933_v47, %v929_v45  ;;  %vm943_vm14 = vmor %vm941_vm13, %vm942_vm12  ;;  %v1752_v61 = vpop.eup %1751  ;;  %v1200_v47 = vlaneseq  ;;  %vm1222_vm11 = vcmask 8192  }
 0x272   :  { %v938_v48 = vsub.f32 1.0, %v937_v44  ;;  %v965_v54 = vsub.f32 1.0, %v934_v49  ;;  %v969_v63 = vmul.f32 %v934_v49, %v2228_v17  ;;  %v1133_v17 = vpop.f32.mrf.mxu1 }
 0x273   :  { %v1134_v9 = vadd.f32 %v1729_v4, %v1133_v17 }
 0x274   :  { %v939_v51 = vmul.f32 %v1748_v42, %v938_v48  ;;  %v967_v60 = vmul.f32 %v1750_v57, %v965_v54 }
 0x276   :  { %v940_v53 = vadd.f32 %v1748_v42, %v939_v51  ;;  %v971_v1 = vadd.f32 %v969_v63, %v967_v60 }
 0x278   :  { %v944_v56 = vsel %vm943_vm14, %v1748_v42, %v940_v53  ;;  %v1201_v53 = vand.u32 127, %v1200_v47 }
 0x279   :  { %v949_v58 = vsel %vm946_vm15, %v948_v55, %v944_v56 }
 0x27a   :  { %v966_v59 = vsub.f32 1.0, %v949_v58  ;;  %v970_v0 = vmul.f32 %v949_v58, %v2230_v18  ;;  %v1137_v18 = vmax.f32 %v1134_v9, 0.0 }
 0x27c   :  { %v968_v62 = vmul.f32 %v1752_v61, %v966_v59  ;;  %v1149_v10 = vmul.f32 %v1730_v7, %v1137_v18 }
 0x27e   :  { %v972_v2 = vadd.f32 %v970_v0, %v968_v62  ;;  %1152 = vadd.xlane.f32.xlu1 %v1149_v10 }
 0x280   :  { %v973_v3 = vpack.c.bf16 %v972_v2, %v971_v1 }
 0x282   :  { %1048 = vmatmul.bf16.vlgmr.msra.gmra.mxu0 %v973_v3 }
 0x2b6   :  { %v1204_v45 = vpop.permute.xlu2 %1203 }
 0x2b7   :  { %vm1208_vm5 = vcmp.eq.s32.totalorder %v1204_v45, %v1201_v53 }
 0x2be   :  { %v1207_v61 = vpop.permute.xlu2 %1206 }
 0x2bf   :  { %vm1209_vm10 = vcmp.eq.s32.totalorder %v1207_v61, %v1201_v53 }
 0x2e3   :  { %v1151_v26 = vpop.xlane.xlu1 %1150 }
 0x2f1   :  { %v1153_v33 = vpop.xlane.xlu1 %1152 }
 0x2ff   :  { %v1049_v16 = vpop.f32.mrf.mxu0 }
 0x300   :  { %v1050_v14 = vadd.f32 %v1731_v15, %v1049_v16 }
 0x302   :  { %v1054_v20 = vmax.f32 %v1050_v14, 0.0 }
 0x304   :  { %v1140_v21 = vmul.f32 %v1732_v19, %v1054_v20 }
 0x306   :  { %1142 = vadd.xlane.f32.xlu0 %v1140_v21 }
 0x307   :  { %v1051_v22 = vpop.f32.mrf.mxu0 }
 0x308   :  { %v1052_v23 = vadd.f32 %v1731_v15, %v1051_v22 }
 0x30a   :  { %v1055_v24 = vmax.f32 %v1052_v23, 0.0 }
 0x30c   :  { %v1141_v25 = vmul.f32 %v1732_v19, %v1055_v24 }
 0x30e   :  { %1144 = vadd.xlane.f32.xlu0 %v1141_v25 }
 0x379   :  { %v1143_v29 = vpop.xlane.xlu0 %1142 }
 0x37a   :  { %v1154_v30 = vadd.f32 %v1151_v26, %v1143_v29 }
 0x37c   :  { %v1158_v31 = vadd.f32 %v1157_v28, %v1154_v30 }
 0x37e   :  { %v1595_v32 = vmul.f32 -1.442695, %v1158_v31 }
 0x380   :  { %1753 = vpow2.f32 %v1595_v32 }
 0x381   :  { %v1145_v34 = vpop.xlane.xlu0 %1144 }
 0x382   :  { %v1155_v35 = vadd.f32 %v1153_v33, %v1145_v34 }
 0x384   :  { %v1159_v36 = vadd.f32 %v1157_v28, %v1155_v35 }
 0x386   :  { %v1754_v37 = vpop.eup %1753  ;;  %v1596_v38 = vmul.f32 -1.442695, %v1159_v36 }
 0x387   :  { %v1166_v39 = vadd.f32 1.0, %v1754_v37 }
 0x388   :  { %1755 = vpow2.f32 %v1596_v38 }
 0x389   :  { %1757 = vrcp.f32 %v1166_v39  ;;  %v1179_v50 = vand.u32 2147483648, %v1166_v39  ;;  %vm1173_vm1 = vweird.f32 %v1166_v39  ;;  %v1177_v51 = vand.u32 2147483647, %v1166_v39 }
 0x38b   :  { %v1180_v56 = vor.u32 1.1754944e-38, %v1179_v50  ;;  %vm1178_vm3 = vcmp.eq.f32.partialorder %v1177_v51, 8.507059e+37 }
 0x38e   :  { %v1756_v40 = vpop.eup %1755 }
 0x38f   :  { %v1758_v41 = vpop.eup %1757  ;;  %v1167_v42 = vadd.f32 1.0, %v1756_v40 }
 0x390   :  { %v1169_v43 = vmul.f32 %v1758_v41, %v1166_v39  ;;  %vm1174_vm0 = vweird.f32 %v1758_v41 }
 0x391   :  { %1759 = vrcp.f32 %v1167_v42  ;;  %vm1175_vm2 = vmor %vm1173_vm1, %vm1174_vm0  ;;  %v1194_v57 = vand.u32 2147483648, %v1167_v42  ;;  %v1192_v59 = vand.u32 2147483647, %v1167_v42  ;;  %vm1188_vm6 = vweird.f32 %v1167_v42 }
 0x392   :  { %v1170_v44 = vsub.f32 1.0, %v1169_v43 }
 0x393   :  { %v1195_v63 = vor.u32 1.1754944e-38, %v1194_v57  ;;  %vm1193_vm9 = vcmp.eq.f32.partialorder %v1192_v59, 8.507059e+37 }
 0x394   :  { %v1171_v46 = vmul.f32 %v1758_v41, %v1170_v44 }
 0x396   :  { %v1172_v48 = vadd.f32 %v1758_v41, %v1171_v46 }
 0x397   :  { %v1760_v49 = vpop.eup %1759 }
 0x398   :  { %v1184_v52 = vmul.f32 %v1760_v49, %v1167_v42  ;;  %v1176_v54 = vsel %vm1175_vm2, %v1758_v41, %v1172_v48  ;;  %vm1189_vm4 = vweird.f32 %v1760_v49 }
 0x399   :  { %v1181_v60 = vsel %vm1178_vm3, %v1180_v56, %v1176_v54  ;;  %vm1190_vm7 = vmor %vm1188_vm6, %vm1189_vm4 }
 0x39a   :  { %v1185_v55 = vsub.f32 1.0, %v1184_v52  ;;  %v1210_v0 = vsel %vm1208_vm5, %v1181_v60, 0.0 }
 0x39b   :  { %v1213_v4 = vsel %vm1212_vm8, %v1210_v0, 0.0 }
 0x39c   :  { %v1186_v58 = vmul.f32 %v1760_v49, %v1185_v55 }
 0x39e   :  { %v1187_v62 = vadd.f32 %v1760_v49, %v1186_v58 }
 0x3a0   :  { %v1191_v1 = vsel %vm1190_vm7, %v1760_v49, %v1187_v62 }
 0x3a1   :  { %v1196_v2 = vsel %vm1193_vm9, %v1195_v63, %v1191_v1 }
 0x3a2   :  { %v1211_v3 = vsel %vm1209_vm10, %v1196_v2, 0.0 }
 0x3a3   :  { %v1214_v5 = vsel %vm1212_vm8, %v1211_v3, 0.0 }
 0x3a4   :  { %v1215_v6 = vadd.f32 %v1214_v5, %v1213_v4 }
 0x3a6   :  { %v1216_v7 = vrot.slane %v1215_v6, 4 }
 0x3a8   :  { %v1217_v8 = vadd.f32 %v1216_v7, %v1215_v6 }
 0x3aa   :  { %v1218_v27 = vrot.slane %v1217_v8, 2 }
 0x3ac   :  { %v1219_v17 = vadd.f32 %v1218_v27, %v1217_v8 }
 0x3ae   :  { %v1220_v9 = vrot.slane %v1219_v17, 1 }
 0x3b0   :  { %v1221_v18 = vadd.f32 %v1220_v9, %v1219_v17 }
 0x3b2   :  { %1223 = vst.msk [vmem:[#allocation29] sm:$0x1] %vm1222_vm11, %v1221_v18 }
 0x3b3   :  { %1234 = dma.vmem_to_hbm [thread:$0]  %s1230_s3, 16, %s1232_s6, [#allocation10]  }
 0x3b4   :  { %2053 = dma.done.wait [#allocation10], 16  }
 0x3b5   :  { %2054 = vsyncadd [#allocation10], 4294967280 }
 0x3b6   :  { %1239 = vsyncpa [#allocation9], 1 }
 0x3b7   :  { %1240 = vsyncpa [#allocation19], 1 }
 0x3b8   :  { %1241 = vsyncpa [#allocation22], 1 }
 0x3b9   :  { %1242 = vsyncpa [#allocation25], 1 }
 0x3ba   :  { %1243 = vsyncpa [#allocation28], 1 }
 0x3bb   :  { %1244 = vsyncpa [#allocation10], 1 }
 0x3bc   :  { %1245 = vsyncpa [#allocation11], 1 }
 0x3bd   :  { %1246 = vsyncpa [#allocation13], 1 }
 0x3be   :  { %1247 = vsyncpa [#allocation16], 1 }

</bundles_post_ra>
